<compile_context>
chip_gen: v7x
topology: tpu7x:2x2x1
jax: 0.10.0
libtpu: 0.0.40
codegen_flags: <defaults>
</compile_context>

<pallas_src>
from functools import partial

import jax
import jax.numpy as jnp
from jax import lax
from jax.experimental import pallas as pl
from jax.experimental.pallas import tpu as pltpu

LANES = 128          # lane width of a vreg
CHUNK = 8            # rows per inner-loop step (one f32 vreg per value)
UNROLL = 4           # inner-loop unroll factor
MAX_TILE_ROWS = 512  # upper bound on rows per grid step (BlockSpec tile)


def _round_up(x, m):
    return ((x + m - 1) // m) * m


def zpredictor_kernel(xn_ref, xd_ref, w1_ref, b1_ref, w2_ref, b2_ref, o_ref,
                      *, hid, num_chunks):
    # xn_ref, xd_ref : (tile_rows, 128) f32 in VMEM -- batch folded onto lanes
    # w1_ref (2,hid) / b1_ref (hid,) / w2_ref (hid,) / b2_ref (1,) : f32 SMEM
    # o_ref          : (tile_rows, 128) f32 in VMEM

    # Hoist the 97 scalar parameter reads out of the row-chunk loop: read once
    # per grid step (scalar path), not once per chunk.
    w1n = [w1_ref[0, j] for j in range(hid)]
    w1d = [w1_ref[1, j] for j in range(hid)]
    b1 = [b1_ref[j] for j in range(hid)]
    w2 = [w2_ref[j] for j in range(hid)]
    b2 = b2_ref[0]

    def body(c, carry):
        r0 = pl.multiple_of(c * CHUNK, CHUNK)
        xn = xn_ref[pl.ds(r0, CHUNK), :]          # 1 vreg
        xd = xd_ref[pl.ds(r0, CHUNK), :]          # 1 vreg

        # fc1 -> ReLU -> fc2, accumulated directly (starts from fc2 bias).
        acc = jnp.full_like(xn, b2)
        for j in range(hid):                      # unrolled at trace time
            h = xn * w1n[j] + xd * w1d[j] + b1[j]
            h = jnp.maximum(h, 0.0)               # ReLU
            acc = acc + h * w2[j]

        # Numerically safe sigmoid: the clamp prevents exp overflow
        # (inf * 0 -> NaN); exp + approx reciprocal run on the EUP; one Newton
        # step (3 VPU ops, ~1% of the op budget) recovers full f32 accuracy.
        z = jnp.clip(acc, -30.0, 30.0)
        e = jnp.exp(-z)
        d = 1.0 + e
        r = pl.reciprocal(d, approx=True)
        r = r * (2.0 - d * r)
        o_ref[pl.ds(r0, CHUNK), :] = r
        return carry

    lax.fori_loop(0, num_chunks, body, 0, unroll=min(UNROLL, num_chunks))


def zpredictor_forward(x_n, x_delta, w1, b1, w2, b2):
    """x_n, x_delta: (B, 1) float32.  Returns (B, 1) float32 = sigmoid(MLP(x))."""
    B = x_n.shape[0]
    hid = w1.shape[1]

    xn = x_n.reshape(-1).astype(jnp.float32)
    xd = x_delta.reshape(-1).astype(jnp.float32)

    # Fold the batch onto the lane axis: (B,) -> (rows, 128), padding rows only
    # to the 8-row CHUNK granule.
    rows = _round_up(max(pl.cdiv(B, LANES), 1), CHUNK)

    if rows >= 2 * CHUNK:
        # >=2 grid steps whenever possible (v7x megacore), last tile ~full.
        num_tiles = max(2, pl.cdiv(rows, MAX_TILE_ROWS))
        tile_rows = _round_up(pl.cdiv(rows, num_tiles), CHUNK)
        num_tiles = pl.cdiv(rows, tile_rows)
    else:
        tile_rows = rows
        num_tiles = 1
    rows_padded = num_tiles * tile_rows

    padded = rows_padded * LANES
    # NOTE(perf review #4): the pad + final slice are one extra HBM pass each;
    # callers that can consume the padded (rows,128) slab directly should do so.
    if padded != B:
        xn = jnp.pad(xn, (0, padded - B))
        xd = jnp.pad(xd, (0, padded - B))
    xn = xn.reshape(rows_padded, LANES)
    xd = xd.reshape(rows_padded, LANES)

    w1_s = w1.astype(jnp.float32)                 # (2, hid)
    b1_s = b1.reshape(-1).astype(jnp.float32)     # (hid,)
    w2_s = w2.reshape(-1).astype(jnp.float32)     # (hid,)
    b2_s = b2.reshape(-1).astype(jnp.float32)     # (1,)

    lane_spec = pl.BlockSpec((tile_rows, LANES), lambda i: (i, 0))
    smem_spec = pl.BlockSpec(memory_space=pltpu.MemorySpace.SMEM)

    out = pl.pallas_call(
        partial(zpredictor_kernel, hid=hid, num_chunks=tile_rows // CHUNK),
        out_shape=jax.ShapeDtypeStruct((rows_padded, LANES), jnp.float32),
        grid=(num_tiles,),
        in_specs=[lane_spec, lane_spec, smem_spec, smem_spec, smem_spec,
                  smem_spec],
        out_specs=lane_spec,
        compiler_params=pltpu.CompilerParams(
            dimension_semantics=("parallel",),    # megacore on v7x
        ),
    )(xn, xd, w1_s, b1_s, w2_s, b2_s)

    return out.reshape(-1)[:B].reshape(B, 1)


def reference_forward(x_n, x_delta, w1, b1, w2, b2):
    x = jnp.concatenate([x_n, x_delta], axis=-1)
    h = jnp.maximum(x @ w1 + b1, 0.0)
    z = h @ w2 + b2
    return 1.0 / (1.0 + jnp.exp(-z))


def _run_case(B, key):
    k_xn, k_xd, k_w1, k_b1, k_w2, k_b2 = jax.random.split(key, 6)
    IN, HID, OUT = 2, 32, 1

    # Deterministic synthetic parameters (mimic torch Linear uniform init).
    bound1 = 1.0 / float(IN) ** 0.5
    bound2 = 1.0 / float(HID) ** 0.5
    w1 = jax.random.uniform(k_w1, (IN, HID), jnp.float32, -bound1, bound1)
    b1 = jax.random.uniform(k_b1, (HID,), jnp.float32, -bound1, bound1)
    w2 = jax.random.uniform(k_w2, (HID, OUT), jnp.float32, -bound2, bound2)
    b2 = jax.random.uniform(k_b2, (OUT,), jnp.float32, -bound2, bound2)

    x_n = jax.random.uniform(k_xn, (B, 1), jnp.float32)
    x_delta = jax.random.uniform(k_xd, (B, 1), jnp.float32)

    y = jax.block_until_ready(zpredictor_forward(x_n, x_delta, w1, b1, w2, b2))
    y_ref = reference_forward(x_n, x_delta, w1, b1, w2, b2)
    assert y.shape == (B, 1)
    assert jnp.allclose(y, y_ref, atol=1e-4, rtol=1e-4), (B, y[:4], y_ref[:4])


if __name__ == "__main__":
    key = jax.random.PRNGKey(0)
    k_small, k_multi = jax.random.split(key, 2)

    # Small shape consistent with the module (single tile, padded lane tail).
    _run_case(8, k_small)
    # Multi-tile path: 2 parallel 8-row tiles, no padding.
    _run_case(2048, k_multi)

    print("KERNEL_OK")
</pallas_src>

<mosaic_0001>
module attributes {stable_mosaic.version = 11 : i64} {
  func.func @zpredictor_kernel(%arg0: i32, %arg1: memref<8x128xf32, #tpu.memory_space<vmem>>, %arg2: memref<8x128xf32, #tpu.memory_space<vmem>>, %arg3: memref<2x32xf32, #tpu.memory_space<smem>>, %arg4: memref<32xf32, #tpu.memory_space<smem>>, %arg5: memref<32xf32, #tpu.memory_space<smem>>, %arg6: memref<1xf32, #tpu.memory_space<smem>>, %arg7: memref<8x128xf32, #tpu.memory_space<vmem>>) attributes {dimension_semantics = [#tpu.dimension_semantics<parallel>], iteration_bounds = array<i64: 1>, scalar_prefetch = 0 : i64, scratch_operands = 0 : i64, tpu.core_type = #tpu.core_type<tc>, window_params = [{transform_indices = @transform_0, window_bounds = array<i64: 8, 128>}, {transform_indices = @transform_1, window_bounds = array<i64: 8, 128>}, {transform_indices = @transform_2, window_bounds = array<i64: 2, 32>}, {transform_indices = @transform_3, window_bounds = array<i64: 32>}, {transform_indices = @transform_4, window_bounds = array<i64: 32>}, {transform_indices = @transform_5, window_bounds = array<i64: 1>}, {transform_indices = @transform_6, window_bounds = array<i64: 8, 128>}]} {
    %c0 = arith.constant 0 : index
    %c0_0 = arith.constant 0 : index
    %0 = memref.load %arg3[%c0, %c0_0] : memref<2x32xf32, #tpu.memory_space<smem>>
    %c0_1 = arith.constant 0 : index
    %c1 = arith.constant 1 : index
    %1 = memref.load %arg3[%c0_1, %c1] : memref<2x32xf32, #tpu.memory_space<smem>>
    %c0_2 = arith.constant 0 : index
    %c2 = arith.constant 2 : index
    %2 = memref.load %arg3[%c0_2, %c2] : memref<2x32xf32, #tpu.memory_space<smem>>
    %c0_3 = arith.constant 0 : index
    %c3 = arith.constant 3 : index
    %3 = memref.load %arg3[%c0_3, %c3] : memref<2x32xf32, #tpu.memory_space<smem>>
    %c0_4 = arith.constant 0 : index
    %c4 = arith.constant 4 : index
    %4 = memref.load %arg3[%c0_4, %c4] : memref<2x32xf32, #tpu.memory_space<smem>>
    %c0_5 = arith.constant 0 : index
    %c5 = arith.constant 5 : index
    %5 = memref.load %arg3[%c0_5, %c5] : memref<2x32xf32, #tpu.memory_space<smem>>
    %c0_6 = arith.constant 0 : index
    %c6 = arith.constant 6 : index
    %6 = memref.load %arg3[%c0_6, %c6] : memref<2x32xf32, #tpu.memory_space<smem>>
    %c0_7 = arith.constant 0 : index
    %c7 = arith.constant 7 : index
    %7 = memref.load %arg3[%c0_7, %c7] : memref<2x32xf32, #tpu.memory_space<smem>>
    %c0_8 = arith.constant 0 : index
    %c8 = arith.constant 8 : index
    %8 = memref.load %arg3[%c0_8, %c8] : memref<2x32xf32, #tpu.memory_space<smem>>
    %c0_9 = arith.constant 0 : index
    %c9 = arith.constant 9 : index
    %9 = memref.load %arg3[%c0_9, %c9] : memref<2x32xf32, #tpu.memory_space<smem>>
    %c0_10 = arith.constant 0 : index
    %c10 = arith.constant 10 : index
    %10 = memref.load %arg3[%c0_10, %c10] : memref<2x32xf32, #tpu.memory_space<smem>>
    %c0_11 = arith.constant 0 : index
    %c11 = arith.constant 11 : index
    %11 = memref.load %arg3[%c0_11, %c11] : memref<2x32xf32, #tpu.memory_space<smem>>
    %c0_12 = arith.constant 0 : index
    %c12 = arith.constant 12 : index
    %12 = memref.load %arg3[%c0_12, %c12] : memref<2x32xf32, #tpu.memory_space<smem>>
    %c0_13 = arith.constant 0 : index
    %c13 = arith.constant 13 : index
    %13 = memref.load %arg3[%c0_13, %c13] : memref<2x32xf32, #tpu.memory_space<smem>>
    %c0_14 = arith.constant 0 : index
    %c14 = arith.constant 14 : index
    %14 = memref.load %arg3[%c0_14, %c14] : memref<2x32xf32, #tpu.memory_space<smem>>
    %c0_15 = arith.constant 0 : index
    %c15 = arith.constant 15 : index
    %15 = memref.load %arg3[%c0_15, %c15] : memref<2x32xf32, #tpu.memory_space<smem>>
    %c0_16 = arith.constant 0 : index
    %c16 = arith.constant 16 : index
    %16 = memref.load %arg3[%c0_16, %c16] : memref<2x32xf32, #tpu.memory_space<smem>>
    %c0_17 = arith.constant 0 : index
    %c17 = arith.constant 17 : index
    %17 = memref.load %arg3[%c0_17, %c17] : memref<2x32xf32, #tpu.memory_space<smem>>
    %c0_18 = arith.constant 0 : index
    %c18 = arith.constant 18 : index
    %18 = memref.load %arg3[%c0_18, %c18] : memref<2x32xf32, #tpu.memory_space<smem>>
    %c0_19 = arith.constant 0 : index
    %c19 = arith.constant 19 : index
    %19 = memref.load %arg3[%c0_19, %c19] : memref<2x32xf32, #tpu.memory_space<smem>>
    %c0_20 = arith.constant 0 : index
    %c20 = arith.constant 20 : index
    %20 = memref.load %arg3[%c0_20, %c20] : memref<2x32xf32, #tpu.memory_space<smem>>
    %c0_21 = arith.constant 0 : index
    %c21 = arith.constant 21 : index
    %21 = memref.load %arg3[%c0_21, %c21] : memref<2x32xf32, #tpu.memory_space<smem>>
    %c0_22 = arith.constant 0 : index
    %c22 = arith.constant 22 : index
    %22 = memref.load %arg3[%c0_22, %c22] : memref<2x32xf32, #tpu.memory_space<smem>>
    %c0_23 = arith.constant 0 : index
    %c23 = arith.constant 23 : index
    %23 = memref.load %arg3[%c0_23, %c23] : memref<2x32xf32, #tpu.memory_space<smem>>
    %c0_24 = arith.constant 0 : index
    %c24 = arith.constant 24 : index
    %24 = memref.load %arg3[%c0_24, %c24] : memref<2x32xf32, #tpu.memory_space<smem>>
    %c0_25 = arith.constant 0 : index
    %c25 = arith.constant 25 : index
    %25 = memref.load %arg3[%c0_25, %c25] : memref<2x32xf32, #tpu.memory_space<smem>>
    %c0_26 = arith.constant 0 : index
    %c26 = arith.constant 26 : index
    %26 = memref.load %arg3[%c0_26, %c26] : memref<2x32xf32, #tpu.memory_space<smem>>
    %c0_27 = arith.constant 0 : index
    %c27 = arith.constant 27 : index
    %27 = memref.load %arg3[%c0_27, %c27] : memref<2x32xf32, #tpu.memory_space<smem>>
    %c0_28 = arith.constant 0 : index
    %c28 = arith.constant 28 : index
    %28 = memref.load %arg3[%c0_28, %c28] : memref<2x32xf32, #tpu.memory_space<smem>>
    %c0_29 = arith.constant 0 : index
    %c29 = arith.constant 29 : index
    %29 = memref.load %arg3[%c0_29, %c29] : memref<2x32xf32, #tpu.memory_space<smem>>
    %c0_30 = arith.constant 0 : index
    %c30 = arith.constant 30 : index
    %30 = memref.load %arg3[%c0_30, %c30] : memref<2x32xf32, #tpu.memory_space<smem>>
    %c0_31 = arith.constant 0 : index
    %c31 = arith.constant 31 : index
    %31 = memref.load %arg3[%c0_31, %c31] : memref<2x32xf32, #tpu.memory_space<smem>>
    %c1_32 = arith.constant 1 : index
    %c0_33 = arith.constant 0 : index
    %32 = memref.load %arg3[%c1_32, %c0_33] : memref<2x32xf32, #tpu.memory_space<smem>>
    %c1_34 = arith.constant 1 : index
    %c1_35 = arith.constant 1 : index
    %33 = memref.load %arg3[%c1_34, %c1_35] : memref<2x32xf32, #tpu.memory_space<smem>>
    %c1_36 = arith.constant 1 : index
    %c2_37 = arith.constant 2 : index
    %34 = memref.load %arg3[%c1_36, %c2_37] : memref<2x32xf32, #tpu.memory_space<smem>>
    %c1_38 = arith.constant 1 : index
    %c3_39 = arith.constant 3 : index
    %35 = memref.load %arg3[%c1_38, %c3_39] : memref<2x32xf32, #tpu.memory_space<smem>>
    %c1_40 = arith.constant 1 : index
    %c4_41 = arith.constant 4 : index
    %36 = memref.load %arg3[%c1_40, %c4_41] : memref<2x32xf32, #tpu.memory_space<smem>>
    %c1_42 = arith.constant 1 : index
    %c5_43 = arith.constant 5 : index
    %37 = memref.load %arg3[%c1_42, %c5_43] : memref<2x32xf32, #tpu.memory_space<smem>>
    %c1_44 = arith.constant 1 : index
    %c6_45 = arith.constant 6 : index
    %38 = memref.load %arg3[%c1_44, %c6_45] : memref<2x32xf32, #tpu.memory_space<smem>>
    %c1_46 = arith.constant 1 : index
    %c7_47 = arith.constant 7 : index
    %39 = memref.load %arg3[%c1_46, %c7_47] : memref<2x32xf32, #tpu.memory_space<smem>>
    %c1_48 = arith.constant 1 : index
    %c8_49 = arith.constant 8 : index
    %40 = memref.load %arg3[%c1_48, %c8_49] : memref<2x32xf32, #tpu.memory_space<smem>>
    %c1_50 = arith.constant 1 : index
    %c9_51 = arith.constant 9 : index
    %41 = memref.load %arg3[%c1_50, %c9_51] : memref<2x32xf32, #tpu.memory_space<smem>>
    %c1_52 = arith.constant 1 : index
    %c10_53 = arith.constant 10 : index
    %42 = memref.load %arg3[%c1_52, %c10_53] : memref<2x32xf32, #tpu.memory_space<smem>>
    %c1_54 = arith.constant 1 : index
    %c11_55 = arith.constant 11 : index
    %43 = memref.load %arg3[%c1_54, %c11_55] : memref<2x32xf32, #tpu.memory_space<smem>>
    %c1_56 = arith.constant 1 : index
    %c12_57 = arith.constant 12 : index
    %44 = memref.load %arg3[%c1_56, %c12_57] : memref<2x32xf32, #tpu.memory_space<smem>>
    %c1_58 = arith.constant 1 : index
    %c13_59 = arith.constant 13 : index
    %45 = memref.load %arg3[%c1_58, %c13_59] : memref<2x32xf32, #tpu.memory_space<smem>>
    %c1_60 = arith.constant 1 : index
    %c14_61 = arith.constant 14 : index
    %46 = memref.load %arg3[%c1_60, %c14_61] : memref<2x32xf32, #tpu.memory_space<smem>>
    %c1_62 = arith.constant 1 : index
    %c15_63 = arith.constant 15 : index
    %47 = memref.load %arg3[%c1_62, %c15_63] : memref<2x32xf32, #tpu.memory_space<smem>>
    %c1_64 = arith.constant 1 : index
    %c16_65 = arith.constant 16 : index
    %48 = memref.load %arg3[%c1_64, %c16_65] : memref<2x32xf32, #tpu.memory_space<smem>>
    %c1_66 = arith.constant 1 : index
    %c17_67 = arith.constant 17 : index
    %49 = memref.load %arg3[%c1_66, %c17_67] : memref<2x32xf32, #tpu.memory_space<smem>>
    %c1_68 = arith.constant 1 : index
    %c18_69 = arith.constant 18 : index
    %50 = memref.load %arg3[%c1_68, %c18_69] : memref<2x32xf32, #tpu.memory_space<smem>>
    %c1_70 = arith.constant 1 : index
    %c19_71 = arith.constant 19 : index
    %51 = memref.load %arg3[%c1_70, %c19_71] : memref<2x32xf32, #tpu.memory_space<smem>>
    %c1_72 = arith.constant 1 : index
    %c20_73 = arith.constant 20 : index
    %52 = memref.load %arg3[%c1_72, %c20_73] : memref<2x32xf32, #tpu.memory_space<smem>>
    %c1_74 = arith.constant 1 : index
    %c21_75 = arith.constant 21 : index
    %53 = memref.load %arg3[%c1_74, %c21_75] : memref<2x32xf32, #tpu.memory_space<smem>>
    %c1_76 = arith.constant 1 : index
    %c22_77 = arith.constant 22 : index
    %54 = memref.load %arg3[%c1_76, %c22_77] : memref<2x32xf32, #tpu.memory_space<smem>>
    %c1_78 = arith.constant 1 : index
    %c23_79 = arith.constant 23 : index
    %55 = memref.load %arg3[%c1_78, %c23_79] : memref<2x32xf32, #tpu.memory_space<smem>>
    %c1_80 = arith.constant 1 : index
    %c24_81 = arith.constant 24 : index
    %56 = memref.load %arg3[%c1_80, %c24_81] : memref<2x32xf32, #tpu.memory_space<smem>>
    %c1_82 = arith.constant 1 : index
    %c25_83 = arith.constant 25 : index
    %57 = memref.load %arg3[%c1_82, %c25_83] : memref<2x32xf32, #tpu.memory_space<smem>>
    %c1_84 = arith.constant 1 : index
    %c26_85 = arith.constant 26 : index
    %58 = memref.load %arg3[%c1_84, %c26_85] : memref<2x32xf32, #tpu.memory_space<smem>>
    %c1_86 = arith.constant 1 : index
    %c27_87 = arith.constant 27 : index
    %59 = memref.load %arg3[%c1_86, %c27_87] : memref<2x32xf32, #tpu.memory_space<smem>>
    %c1_88 = arith.constant 1 : index
    %c28_89 = arith.constant 28 : index
    %60 = memref.load %arg3[%c1_88, %c28_89] : memref<2x32xf32, #tpu.memory_space<smem>>
    %c1_90 = arith.constant 1 : index
    %c29_91 = arith.constant 29 : index
    %61 = memref.load %arg3[%c1_90, %c29_91] : memref<2x32xf32, #tpu.memory_space<smem>>
    %c1_92 = arith.constant 1 : index
    %c30_93 = arith.constant 30 : index
    %62 = memref.load %arg3[%c1_92, %c30_93] : memref<2x32xf32, #tpu.memory_space<smem>>
    %c1_94 = arith.constant 1 : index
    %c31_95 = arith.constant 31 : index
    %63 = memref.load %arg3[%c1_94, %c31_95] : memref<2x32xf32, #tpu.memory_space<smem>>
    %c0_96 = arith.constant 0 : index
    %64 = memref.load %arg4[%c0_96] : memref<32xf32, #tpu.memory_space<smem>>
    %c1_97 = arith.constant 1 : index
    %65 = memref.load %arg4[%c1_97] : memref<32xf32, #tpu.memory_space<smem>>
    %c2_98 = arith.constant 2 : index
    %66 = memref.load %arg4[%c2_98] : memref<32xf32, #tpu.memory_space<smem>>
    %c3_99 = arith.constant 3 : index
    %67 = memref.load %arg4[%c3_99] : memref<32xf32, #tpu.memory_space<smem>>
    %c4_100 = arith.constant 4 : index
    %68 = memref.load %arg4[%c4_100] : memref<32xf32, #tpu.memory_space<smem>>
    %c5_101 = arith.constant 5 : index
    %69 = memref.load %arg4[%c5_101] : memref<32xf32, #tpu.memory_space<smem>>
    %c6_102 = arith.constant 6 : index
    %70 = memref.load %arg4[%c6_102] : memref<32xf32, #tpu.memory_space<smem>>
    %c7_103 = arith.constant 7 : index
    %71 = memref.load %arg4[%c7_103] : memref<32xf32, #tpu.memory_space<smem>>
    %c8_104 = arith.constant 8 : index
    %72 = memref.load %arg4[%c8_104] : memref<32xf32, #tpu.memory_space<smem>>
    %c9_105 = arith.constant 9 : index
    %73 = memref.load %arg4[%c9_105] : memref<32xf32, #tpu.memory_space<smem>>
    %c10_106 = arith.constant 10 : index
    %74 = memref.load %arg4[%c10_106] : memref<32xf32, #tpu.memory_space<smem>>
    %c11_107 = arith.constant 11 : index
    %75 = memref.load %arg4[%c11_107] : memref<32xf32, #tpu.memory_space<smem>>
    %c12_108 = arith.constant 12 : index
    %76 = memref.load %arg4[%c12_108] : memref<32xf32, #tpu.memory_space<smem>>
    %c13_109 = arith.constant 13 : index
    %77 = memref.load %arg4[%c13_109] : memref<32xf32, #tpu.memory_space<smem>>
    %c14_110 = arith.constant 14 : index
    %78 = memref.load %arg4[%c14_110] : memref<32xf32, #tpu.memory_space<smem>>
    %c15_111 = arith.constant 15 : index
    %79 = memref.load %arg4[%c15_111] : memref<32xf32, #tpu.memory_space<smem>>
    %c16_112 = arith.constant 16 : index
    %80 = memref.load %arg4[%c16_112] : memref<32xf32, #tpu.memory_space<smem>>
    %c17_113 = arith.constant 17 : index
    %81 = memref.load %arg4[%c17_113] : memref<32xf32, #tpu.memory_space<smem>>
    %c18_114 = arith.constant 18 : index
    %82 = memref.load %arg4[%c18_114] : memref<32xf32, #tpu.memory_space<smem>>
    %c19_115 = arith.constant 19 : index
    %83 = memref.load %arg4[%c19_115] : memref<32xf32, #tpu.memory_space<smem>>
    %c20_116 = arith.constant 20 : index
    %84 = memref.load %arg4[%c20_116] : memref<32xf32, #tpu.memory_space<smem>>
    %c21_117 = arith.constant 21 : index
    %85 = memref.load %arg4[%c21_117] : memref<32xf32, #tpu.memory_space<smem>>
    %c22_118 = arith.constant 22 : index
    %86 = memref.load %arg4[%c22_118] : memref<32xf32, #tpu.memory_space<smem>>
    %c23_119 = arith.constant 23 : index
    %87 = memref.load %arg4[%c23_119] : memref<32xf32, #tpu.memory_space<smem>>
    %c24_120 = arith.constant 24 : index
    %88 = memref.load %arg4[%c24_120] : memref<32xf32, #tpu.memory_space<smem>>
    %c25_121 = arith.constant 25 : index
    %89 = memref.load %arg4[%c25_121] : memref<32xf32, #tpu.memory_space<smem>>
    %c26_122 = arith.constant 26 : index
    %90 = memref.load %arg4[%c26_122] : memref<32xf32, #tpu.memory_space<smem>>
    %c27_123 = arith.constant 27 : index
    %91 = memref.load %arg4[%c27_123] : memref<32xf32, #tpu.memory_space<smem>>
    %c28_124 = arith.constant 28 : index
    %92 = memref.load %arg4[%c28_124] : memref<32xf32, #tpu.memory_space<smem>>
    %c29_125 = arith.constant 29 : index
    %93 = memref.load %arg4[%c29_125] : memref<32xf32, #tpu.memory_space<smem>>
    %c30_126 = arith.constant 30 : index
    %94 = memref.load %arg4[%c30_126] : memref<32xf32, #tpu.memory_space<smem>>
    %c31_127 = arith.constant 31 : index
    %95 = memref.load %arg4[%c31_127] : memref<32xf32, #tpu.memory_space<smem>>
    %c0_128 = arith.constant 0 : index
    %96 = memref.load %arg5[%c0_128] : memref<32xf32, #tpu.memory_space<smem>>
    %c1_129 = arith.constant 1 : index
    %97 = memref.load %arg5[%c1_129] : memref<32xf32, #tpu.memory_space<smem>>
    %c2_130 = arith.constant 2 : index
    %98 = memref.load %arg5[%c2_130] : memref<32xf32, #tpu.memory_space<smem>>
    %c3_131 = arith.constant 3 : index
    %99 = memref.load %arg5[%c3_131] : memref<32xf32, #tpu.memory_space<smem>>
    %c4_132 = arith.constant 4 : index
    %100 = memref.load %arg5[%c4_132] : memref<32xf32, #tpu.memory_space<smem>>
    %c5_133 = arith.constant 5 : index
    %101 = memref.load %arg5[%c5_133] : memref<32xf32, #tpu.memory_space<smem>>
    %c6_134 = arith.constant 6 : index
    %102 = memref.load %arg5[%c6_134] : memref<32xf32, #tpu.memory_space<smem>>
    %c7_135 = arith.constant 7 : index
    %103 = memref.load %arg5[%c7_135] : memref<32xf32, #tpu.memory_space<smem>>
    %c8_136 = arith.constant 8 : index
    %104 = memref.load %arg5[%c8_136] : memref<32xf32, #tpu.memory_space<smem>>
    %c9_137 = arith.constant 9 : index
    %105 = memref.load %arg5[%c9_137] : memref<32xf32, #tpu.memory_space<smem>>
    %c10_138 = arith.constant 10 : index
    %106 = memref.load %arg5[%c10_138] : memref<32xf32, #tpu.memory_space<smem>>
    %c11_139 = arith.constant 11 : index
    %107 = memref.load %arg5[%c11_139] : memref<32xf32, #tpu.memory_space<smem>>
    %c12_140 = arith.constant 12 : index
    %108 = memref.load %arg5[%c12_140] : memref<32xf32, #tpu.memory_space<smem>>
    %c13_141 = arith.constant 13 : index
    %109 = memref.load %arg5[%c13_141] : memref<32xf32, #tpu.memory_space<smem>>
    %c14_142 = arith.constant 14 : index
    %110 = memref.load %arg5[%c14_142] : memref<32xf32, #tpu.memory_space<smem>>
    %c15_143 = arith.constant 15 : index
    %111 = memref.load %arg5[%c15_143] : memref<32xf32, #tpu.memory_space<smem>>
    %c16_144 = arith.constant 16 : index
    %112 = memref.load %arg5[%c16_144] : memref<32xf32, #tpu.memory_space<smem>>
    %c17_145 = arith.constant 17 : index
    %113 = memref.load %arg5[%c17_145] : memref<32xf32, #tpu.memory_space<smem>>
    %c18_146 = arith.constant 18 : index
    %114 = memref.load %arg5[%c18_146] : memref<32xf32, #tpu.memory_space<smem>>
    %c19_147 = arith.constant 19 : index
    %115 = memref.load %arg5[%c19_147] : memref<32xf32, #tpu.memory_space<smem>>
    %c20_148 = arith.constant 20 : index
    %116 = memref.load %arg5[%c20_148] : memref<32xf32, #tpu.memory_space<smem>>
    %c21_149 = arith.constant 21 : index
    %117 = memref.load %arg5[%c21_149] : memref<32xf32, #tpu.memory_space<smem>>
    %c22_150 = arith.constant 22 : index
    %118 = memref.load %arg5[%c22_150] : memref<32xf32, #tpu.memory_space<smem>>
    %c23_151 = arith.constant 23 : index
    %119 = memref.load %arg5[%c23_151] : memref<32xf32, #tpu.memory_space<smem>>
    %c24_152 = arith.constant 24 : index
    %120 = memref.load %arg5[%c24_152] : memref<32xf32, #tpu.memory_space<smem>>
    %c25_153 = arith.constant 25 : index
    %121 = memref.load %arg5[%c25_153] : memref<32xf32, #tpu.memory_space<smem>>
    %c26_154 = arith.constant 26 : index
    %122 = memref.load %arg5[%c26_154] : memref<32xf32, #tpu.memory_space<smem>>
    %c27_155 = arith.constant 27 : index
    %123 = memref.load %arg5[%c27_155] : memref<32xf32, #tpu.memory_space<smem>>
    %c28_156 = arith.constant 28 : index
    %124 = memref.load %arg5[%c28_156] : memref<32xf32, #tpu.memory_space<smem>>
    %c29_157 = arith.constant 29 : index
    %125 = memref.load %arg5[%c29_157] : memref<32xf32, #tpu.memory_space<smem>>
    %c30_158 = arith.constant 30 : index
    %126 = memref.load %arg5[%c30_158] : memref<32xf32, #tpu.memory_space<smem>>
    %c31_159 = arith.constant 31 : index
    %127 = memref.load %arg5[%c31_159] : memref<32xf32, #tpu.memory_space<smem>>
    %c0_160 = arith.constant 0 : index
    %128 = memref.load %arg6[%c0_160] : memref<1xf32, #tpu.memory_space<smem>>
    %c0_i32 = arith.constant 0 : i32
    %c8_i32 = arith.constant 8 : i32
    %129 = arith.muli %c0_i32, %c8_i32 : i32
    %130 = tpu.assume_multiple %129, 8 : i32
    %131 = arith.index_cast %130 : i32 to index
    %c0_161 = arith.constant 0 : index
    %132 = vector.load %arg1[%131, %c0_161] : memref<8x128xf32, #tpu.memory_space<vmem>>, vector<8x128xf32>
    %133 = arith.index_cast %130 : i32 to index
    %c0_162 = arith.constant 0 : index
    %134 = vector.load %arg2[%133, %c0_162] : memref<8x128xf32, #tpu.memory_space<vmem>>, vector<8x128xf32>
    %135 = vector.broadcast %128 : f32 to vector<8x128xf32>
    %136 = vector.broadcast %0 : f32 to vector<8x128xf32>
    %137 = arith.mulf %132, %136 : vector<8x128xf32>
    %138 = vector.broadcast %32 : f32 to vector<8x128xf32>
    %139 = arith.mulf %134, %138 : vector<8x128xf32>
    %140 = arith.addf %137, %139 : vector<8x128xf32>
    %141 = vector.broadcast %64 : f32 to vector<8x128xf32>
    %142 = arith.addf %140, %141 : vector<8x128xf32>
    %cst = arith.constant 0.000000e+00 : f32
    %143 = vector.broadcast %cst : f32 to vector<8x128xf32>
    %144 = arith.maximumf %142, %143 : vector<8x128xf32>
    %145 = vector.broadcast %96 : f32 to vector<8x128xf32>
    %146 = arith.mulf %144, %145 : vector<8x128xf32>
    %147 = arith.addf %135, %146 : vector<8x128xf32>
    %148 = vector.broadcast %1 : f32 to vector<8x128xf32>
    %149 = arith.mulf %132, %148 : vector<8x128xf32>
    %150 = vector.broadcast %33 : f32 to vector<8x128xf32>
    %151 = arith.mulf %134, %150 : vector<8x128xf32>
    %152 = arith.addf %149, %151 : vector<8x128xf32>
    %153 = vector.broadcast %65 : f32 to vector<8x128xf32>
    %154 = arith.addf %152, %153 : vector<8x128xf32>
    %cst_163 = arith.constant 0.000000e+00 : f32
    %155 = vector.broadcast %cst_163 : f32 to vector<8x128xf32>
    %156 = arith.maximumf %154, %155 : vector<8x128xf32>
    %157 = vector.broadcast %97 : f32 to vector<8x128xf32>
    %158 = arith.mulf %156, %157 : vector<8x128xf32>
    %159 = arith.addf %147, %158 : vector<8x128xf32>
    %160 = vector.broadcast %2 : f32 to vector<8x128xf32>
    %161 = arith.mulf %132, %160 : vector<8x128xf32>
    %162 = vector.broadcast %34 : f32 to vector<8x128xf32>
    %163 = arith.mulf %134, %162 : vector<8x128xf32>
    %164 = arith.addf %161, %163 : vector<8x128xf32>
    %165 = vector.broadcast %66 : f32 to vector<8x128xf32>
    %166 = arith.addf %164, %165 : vector<8x128xf32>
    %cst_164 = arith.constant 0.000000e+00 : f32
    %167 = vector.broadcast %cst_164 : f32 to vector<8x128xf32>
    %168 = arith.maximumf %166, %167 : vector<8x128xf32>
    %169 = vector.broadcast %98 : f32 to vector<8x128xf32>
    %170 = arith.mulf %168, %169 : vector<8x128xf32>
    %171 = arith.addf %159, %170 : vector<8x128xf32>
    %172 = vector.broadcast %3 : f32 to vector<8x128xf32>
    %173 = arith.mulf %132, %172 : vector<8x128xf32>
    %174 = vector.broadcast %35 : f32 to vector<8x128xf32>
    %175 = arith.mulf %134, %174 : vector<8x128xf32>
    %176 = arith.addf %173, %175 : vector<8x128xf32>
    %177 = vector.broadcast %67 : f32 to vector<8x128xf32>
    %178 = arith.addf %176, %177 : vector<8x128xf32>
    %cst_165 = arith.constant 0.000000e+00 : f32
    %179 = vector.broadcast %cst_165 : f32 to vector<8x128xf32>
    %180 = arith.maximumf %178, %179 : vector<8x128xf32>
    %181 = vector.broadcast %99 : f32 to vector<8x128xf32>
    %182 = arith.mulf %180, %181 : vector<8x128xf32>
    %183 = arith.addf %171, %182 : vector<8x128xf32>
    %184 = vector.broadcast %4 : f32 to vector<8x128xf32>
    %185 = arith.mulf %132, %184 : vector<8x128xf32>
    %186 = vector.broadcast %36 : f32 to vector<8x128xf32>
    %187 = arith.mulf %134, %186 : vector<8x128xf32>
    %188 = arith.addf %185, %187 : vector<8x128xf32>
    %189 = vector.broadcast %68 : f32 to vector<8x128xf32>
    %190 = arith.addf %188, %189 : vector<8x128xf32>
    %cst_166 = arith.constant 0.000000e+00 : f32
    %191 = vector.broadcast %cst_166 : f32 to vector<8x128xf32>
    %192 = arith.maximumf %190, %191 : vector<8x128xf32>
    %193 = vector.broadcast %100 : f32 to vector<8x128xf32>
    %194 = arith.mulf %192, %193 : vector<8x128xf32>
    %195 = arith.addf %183, %194 : vector<8x128xf32>
    %196 = vector.broadcast %5 : f32 to vector<8x128xf32>
    %197 = arith.mulf %132, %196 : vector<8x128xf32>
    %198 = vector.broadcast %37 : f32 to vector<8x128xf32>
    %199 = arith.mulf %134, %198 : vector<8x128xf32>
    %200 = arith.addf %197, %199 : vector<8x128xf32>
    %201 = vector.broadcast %69 : f32 to vector<8x128xf32>
    %202 = arith.addf %200, %201 : vector<8x128xf32>
    %cst_167 = arith.constant 0.000000e+00 : f32
    %203 = vector.broadcast %cst_167 : f32 to vector<8x128xf32>
    %204 = arith.maximumf %202, %203 : vector<8x128xf32>
    %205 = vector.broadcast %101 : f32 to vector<8x128xf32>
    %206 = arith.mulf %204, %205 : vector<8x128xf32>
    %207 = arith.addf %195, %206 : vector<8x128xf32>
    %208 = vector.broadcast %6 : f32 to vector<8x128xf32>
    %209 = arith.mulf %132, %208 : vector<8x128xf32>
    %210 = vector.broadcast %38 : f32 to vector<8x128xf32>
    %211 = arith.mulf %134, %210 : vector<8x128xf32>
    %212 = arith.addf %209, %211 : vector<8x128xf32>
    %213 = vector.broadcast %70 : f32 to vector<8x128xf32>
    %214 = arith.addf %212, %213 : vector<8x128xf32>
    %cst_168 = arith.constant 0.000000e+00 : f32
    %215 = vector.broadcast %cst_168 : f32 to vector<8x128xf32>
    %216 = arith.maximumf %214, %215 : vector<8x128xf32>
    %217 = vector.broadcast %102 : f32 to vector<8x128xf32>
    %218 = arith.mulf %216, %217 : vector<8x128xf32>
    %219 = arith.addf %207, %218 : vector<8x128xf32>
    %220 = vector.broadcast %7 : f32 to vector<8x128xf32>
    %221 = arith.mulf %132, %220 : vector<8x128xf32>
    %222 = vector.broadcast %39 : f32 to vector<8x128xf32>
    %223 = arith.mulf %134, %222 : vector<8x128xf32>
    %224 = arith.addf %221, %223 : vector<8x128xf32>
    %225 = vector.broadcast %71 : f32 to vector<8x128xf32>
    %226 = arith.addf %224, %225 : vector<8x128xf32>
    %cst_169 = arith.constant 0.000000e+00 : f32
    %227 = vector.broadcast %cst_169 : f32 to vector<8x128xf32>
    %228 = arith.maximumf %226, %227 : vector<8x128xf32>
    %229 = vector.broadcast %103 : f32 to vector<8x128xf32>
    %230 = arith.mulf %228, %229 : vector<8x128xf32>
    %231 = arith.addf %219, %230 : vector<8x128xf32>
    %232 = vector.broadcast %8 : f32 to vector<8x128xf32>
    %233 = arith.mulf %132, %232 : vector<8x128xf32>
    %234 = vector.broadcast %40 : f32 to vector<8x128xf32>
    %235 = arith.mulf %134, %234 : vector<8x128xf32>
    %236 = arith.addf %233, %235 : vector<8x128xf32>
    %237 = vector.broadcast %72 : f32 to vector<8x128xf32>
    %238 = arith.addf %236, %237 : vector<8x128xf32>
    %cst_170 = arith.constant 0.000000e+00 : f32
    %239 = vector.broadcast %cst_170 : f32 to vector<8x128xf32>
    %240 = arith.maximumf %238, %239 : vector<8x128xf32>
    %241 = vector.broadcast %104 : f32 to vector<8x128xf32>
    %242 = arith.mulf %240, %241 : vector<8x128xf32>
    %243 = arith.addf %231, %242 : vector<8x128xf32>
    %244 = vector.broadcast %9 : f32 to vector<8x128xf32>
    %245 = arith.mulf %132, %244 : vector<8x128xf32>
    %246 = vector.broadcast %41 : f32 to vector<8x128xf32>
    %247 = arith.mulf %134, %246 : vector<8x128xf32>
    %248 = arith.addf %245, %247 : vector<8x128xf32>
    %249 = vector.broadcast %73 : f32 to vector<8x128xf32>
    %250 = arith.addf %248, %249 : vector<8x128xf32>
    %cst_171 = arith.constant 0.000000e+00 : f32
    %251 = vector.broadcast %cst_171 : f32 to vector<8x128xf32>
    %252 = arith.maximumf %250, %251 : vector<8x128xf32>
    %253 = vector.broadcast %105 : f32 to vector<8x128xf32>
    %254 = arith.mulf %252, %253 : vector<8x128xf32>
    %255 = arith.addf %243, %254 : vector<8x128xf32>
    %256 = vector.broadcast %10 : f32 to vector<8x128xf32>
    %257 = arith.mulf %132, %256 : vector<8x128xf32>
    %258 = vector.broadcast %42 : f32 to vector<8x128xf32>
    %259 = arith.mulf %134, %258 : vector<8x128xf32>
    %260 = arith.addf %257, %259 : vector<8x128xf32>
    %261 = vector.broadcast %74 : f32 to vector<8x128xf32>
    %262 = arith.addf %260, %261 : vector<8x128xf32>
    %cst_172 = arith.constant 0.000000e+00 : f32
    %263 = vector.broadcast %cst_172 : f32 to vector<8x128xf32>
    %264 = arith.maximumf %262, %263 : vector<8x128xf32>
    %265 = vector.broadcast %106 : f32 to vector<8x128xf32>
    %266 = arith.mulf %264, %265 : vector<8x128xf32>
    %267 = arith.addf %255, %266 : vector<8x128xf32>
    %268 = vector.broadcast %11 : f32 to vector<8x128xf32>
    %269 = arith.mulf %132, %268 : vector<8x128xf32>
    %270 = vector.broadcast %43 : f32 to vector<8x128xf32>
    %271 = arith.mulf %134, %270 : vector<8x128xf32>
    %272 = arith.addf %269, %271 : vector<8x128xf32>
    %273 = vector.broadcast %75 : f32 to vector<8x128xf32>
    %274 = arith.addf %272, %273 : vector<8x128xf32>
    %cst_173 = arith.constant 0.000000e+00 : f32
    %275 = vector.broadcast %cst_173 : f32 to vector<8x128xf32>
    %276 = arith.maximumf %274, %275 : vector<8x128xf32>
    %277 = vector.broadcast %107 : f32 to vector<8x128xf32>
    %278 = arith.mulf %276, %277 : vector<8x128xf32>
    %279 = arith.addf %267, %278 : vector<8x128xf32>
    %280 = vector.broadcast %12 : f32 to vector<8x128xf32>
    %281 = arith.mulf %132, %280 : vector<8x128xf32>
    %282 = vector.broadcast %44 : f32 to vector<8x128xf32>
    %283 = arith.mulf %134, %282 : vector<8x128xf32>
    %284 = arith.addf %281, %283 : vector<8x128xf32>
    %285 = vector.broadcast %76 : f32 to vector<8x128xf32>
    %286 = arith.addf %284, %285 : vector<8x128xf32>
    %cst_174 = arith.constant 0.000000e+00 : f32
    %287 = vector.broadcast %cst_174 : f32 to vector<8x128xf32>
    %288 = arith.maximumf %286, %287 : vector<8x128xf32>
    %289 = vector.broadcast %108 : f32 to vector<8x128xf32>
    %290 = arith.mulf %288, %289 : vector<8x128xf32>
    %291 = arith.addf %279, %290 : vector<8x128xf32>
    %292 = vector.broadcast %13 : f32 to vector<8x128xf32>
    %293 = arith.mulf %132, %292 : vector<8x128xf32>
    %294 = vector.broadcast %45 : f32 to vector<8x128xf32>
    %295 = arith.mulf %134, %294 : vector<8x128xf32>
    %296 = arith.addf %293, %295 : vector<8x128xf32>
    %297 = vector.broadcast %77 : f32 to vector<8x128xf32>
    %298 = arith.addf %296, %297 : vector<8x128xf32>
    %cst_175 = arith.constant 0.000000e+00 : f32
    %299 = vector.broadcast %cst_175 : f32 to vector<8x128xf32>
    %300 = arith.maximumf %298, %299 : vector<8x128xf32>
    %301 = vector.broadcast %109 : f32 to vector<8x128xf32>
    %302 = arith.mulf %300, %301 : vector<8x128xf32>
    %303 = arith.addf %291, %302 : vector<8x128xf32>
    %304 = vector.broadcast %14 : f32 to vector<8x128xf32>
    %305 = arith.mulf %132, %304 : vector<8x128xf32>
    %306 = vector.broadcast %46 : f32 to vector<8x128xf32>
    %307 = arith.mulf %134, %306 : vector<8x128xf32>
    %308 = arith.addf %305, %307 : vector<8x128xf32>
    %309 = vector.broadcast %78 : f32 to vector<8x128xf32>
    %310 = arith.addf %308, %309 : vector<8x128xf32>
    %cst_176 = arith.constant 0.000000e+00 : f32
    %311 = vector.broadcast %cst_176 : f32 to vector<8x128xf32>
    %312 = arith.maximumf %310, %311 : vector<8x128xf32>
    %313 = vector.broadcast %110 : f32 to vector<8x128xf32>
    %314 = arith.mulf %312, %313 : vector<8x128xf32>
    %315 = arith.addf %303, %314 : vector<8x128xf32>
    %316 = vector.broadcast %15 : f32 to vector<8x128xf32>
    %317 = arith.mulf %132, %316 : vector<8x128xf32>
    %318 = vector.broadcast %47 : f32 to vector<8x128xf32>
    %319 = arith.mulf %134, %318 : vector<8x128xf32>
    %320 = arith.addf %317, %319 : vector<8x128xf32>
    %321 = vector.broadcast %79 : f32 to vector<8x128xf32>
    %322 = arith.addf %320, %321 : vector<8x128xf32>
    %cst_177 = arith.constant 0.000000e+00 : f32
    %323 = vector.broadcast %cst_177 : f32 to vector<8x128xf32>
    %324 = arith.maximumf %322, %323 : vector<8x128xf32>
    %325 = vector.broadcast %111 : f32 to vector<8x128xf32>
    %326 = arith.mulf %324, %325 : vector<8x128xf32>
    %327 = arith.addf %315, %326 : vector<8x128xf32>
    %328 = vector.broadcast %16 : f32 to vector<8x128xf32>
    %329 = arith.mulf %132, %328 : vector<8x128xf32>
    %330 = vector.broadcast %48 : f32 to vector<8x128xf32>
    %331 = arith.mulf %134, %330 : vector<8x128xf32>
    %332 = arith.addf %329, %331 : vector<8x128xf32>
    %333 = vector.broadcast %80 : f32 to vector<8x128xf32>
    %334 = arith.addf %332, %333 : vector<8x128xf32>
    %cst_178 = arith.constant 0.000000e+00 : f32
    %335 = vector.broadcast %cst_178 : f32 to vector<8x128xf32>
    %336 = arith.maximumf %334, %335 : vector<8x128xf32>
    %337 = vector.broadcast %112 : f32 to vector<8x128xf32>
    %338 = arith.mulf %336, %337 : vector<8x128xf32>
    %339 = arith.addf %327, %338 : vector<8x128xf32>
    %340 = vector.broadcast %17 : f32 to vector<8x128xf32>
    %341 = arith.mulf %132, %340 : vector<8x128xf32>
    %342 = vector.broadcast %49 : f32 to vector<8x128xf32>
    %343 = arith.mulf %134, %342 : vector<8x128xf32>
    %344 = arith.addf %341, %343 : vector<8x128xf32>
    %345 = vector.broadcast %81 : f32 to vector<8x128xf32>
    %346 = arith.addf %344, %345 : vector<8x128xf32>
    %cst_179 = arith.constant 0.000000e+00 : f32
    %347 = vector.broadcast %cst_179 : f32 to vector<8x128xf32>
    %348 = arith.maximumf %346, %347 : vector<8x128xf32>
    %349 = vector.broadcast %113 : f32 to vector<8x128xf32>
    %350 = arith.mulf %348, %349 : vector<8x128xf32>
    %351 = arith.addf %339, %350 : vector<8x128xf32>
    %352 = vector.broadcast %18 : f32 to vector<8x128xf32>
    %353 = arith.mulf %132, %352 : vector<8x128xf32>
    %354 = vector.broadcast %50 : f32 to vector<8x128xf32>
    %355 = arith.mulf %134, %354 : vector<8x128xf32>
    %356 = arith.addf %353, %355 : vector<8x128xf32>
    %357 = vector.broadcast %82 : f32 to vector<8x128xf32>
    %358 = arith.addf %356, %357 : vector<8x128xf32>
    %cst_180 = arith.constant 0.000000e+00 : f32
    %359 = vector.broadcast %cst_180 : f32 to vector<8x128xf32>
    %360 = arith.maximumf %358, %359 : vector<8x128xf32>
    %361 = vector.broadcast %114 : f32 to vector<8x128xf32>
    %362 = arith.mulf %360, %361 : vector<8x128xf32>
    %363 = arith.addf %351, %362 : vector<8x128xf32>
    %364 = vector.broadcast %19 : f32 to vector<8x128xf32>
    %365 = arith.mulf %132, %364 : vector<8x128xf32>
    %366 = vector.broadcast %51 : f32 to vector<8x128xf32>
    %367 = arith.mulf %134, %366 : vector<8x128xf32>
    %368 = arith.addf %365, %367 : vector<8x128xf32>
    %369 = vector.broadcast %83 : f32 to vector<8x128xf32>
    %370 = arith.addf %368, %369 : vector<8x128xf32>
    %cst_181 = arith.constant 0.000000e+00 : f32
    %371 = vector.broadcast %cst_181 : f32 to vector<8x128xf32>
    %372 = arith.maximumf %370, %371 : vector<8x128xf32>
    %373 = vector.broadcast %115 : f32 to vector<8x128xf32>
    %374 = arith.mulf %372, %373 : vector<8x128xf32>
    %375 = arith.addf %363, %374 : vector<8x128xf32>
    %376 = vector.broadcast %20 : f32 to vector<8x128xf32>
    %377 = arith.mulf %132, %376 : vector<8x128xf32>
    %378 = vector.broadcast %52 : f32 to vector<8x128xf32>
    %379 = arith.mulf %134, %378 : vector<8x128xf32>
    %380 = arith.addf %377, %379 : vector<8x128xf32>
    %381 = vector.broadcast %84 : f32 to vector<8x128xf32>
    %382 = arith.addf %380, %381 : vector<8x128xf32>
    %cst_182 = arith.constant 0.000000e+00 : f32
    %383 = vector.broadcast %cst_182 : f32 to vector<8x128xf32>
    %384 = arith.maximumf %382, %383 : vector<8x128xf32>
    %385 = vector.broadcast %116 : f32 to vector<8x128xf32>
    %386 = arith.mulf %384, %385 : vector<8x128xf32>
    %387 = arith.addf %375, %386 : vector<8x128xf32>
    %388 = vector.broadcast %21 : f32 to vector<8x128xf32>
    %389 = arith.mulf %132, %388 : vector<8x128xf32>
    %390 = vector.broadcast %53 : f32 to vector<8x128xf32>
    %391 = arith.mulf %134, %390 : vector<8x128xf32>
    %392 = arith.addf %389, %391 : vector<8x128xf32>
    %393 = vector.broadcast %85 : f32 to vector<8x128xf32>
    %394 = arith.addf %392, %393 : vector<8x128xf32>
    %cst_183 = arith.constant 0.000000e+00 : f32
    %395 = vector.broadcast %cst_183 : f32 to vector<8x128xf32>
    %396 = arith.maximumf %394, %395 : vector<8x128xf32>
    %397 = vector.broadcast %117 : f32 to vector<8x128xf32>
    %398 = arith.mulf %396, %397 : vector<8x128xf32>
    %399 = arith.addf %387, %398 : vector<8x128xf32>
    %400 = vector.broadcast %22 : f32 to vector<8x128xf32>
    %401 = arith.mulf %132, %400 : vector<8x128xf32>
    %402 = vector.broadcast %54 : f32 to vector<8x128xf32>
    %403 = arith.mulf %134, %402 : vector<8x128xf32>
    %404 = arith.addf %401, %403 : vector<8x128xf32>
    %405 = vector.broadcast %86 : f32 to vector<8x128xf32>
    %406 = arith.addf %404, %405 : vector<8x128xf32>
    %cst_184 = arith.constant 0.000000e+00 : f32
    %407 = vector.broadcast %cst_184 : f32 to vector<8x128xf32>
    %408 = arith.maximumf %406, %407 : vector<8x128xf32>
    %409 = vector.broadcast %118 : f32 to vector<8x128xf32>
    %410 = arith.mulf %408, %409 : vector<8x128xf32>
    %411 = arith.addf %399, %410 : vector<8x128xf32>
    %412 = vector.broadcast %23 : f32 to vector<8x128xf32>
    %413 = arith.mulf %132, %412 : vector<8x128xf32>
    %414 = vector.broadcast %55 : f32 to vector<8x128xf32>
    %415 = arith.mulf %134, %414 : vector<8x128xf32>
    %416 = arith.addf %413, %415 : vector<8x128xf32>
    %417 = vector.broadcast %87 : f32 to vector<8x128xf32>
    %418 = arith.addf %416, %417 : vector<8x128xf32>
    %cst_185 = arith.constant 0.000000e+00 : f32
    %419 = vector.broadcast %cst_185 : f32 to vector<8x128xf32>
    %420 = arith.maximumf %418, %419 : vector<8x128xf32>
    %421 = vector.broadcast %119 : f32 to vector<8x128xf32>
    %422 = arith.mulf %420, %421 : vector<8x128xf32>
    %423 = arith.addf %411, %422 : vector<8x128xf32>
    %424 = vector.broadcast %24 : f32 to vector<8x128xf32>
    %425 = arith.mulf %132, %424 : vector<8x128xf32>
    %426 = vector.broadcast %56 : f32 to vector<8x128xf32>
    %427 = arith.mulf %134, %426 : vector<8x128xf32>
    %428 = arith.addf %425, %427 : vector<8x128xf32>
    %429 = vector.broadcast %88 : f32 to vector<8x128xf32>
    %430 = arith.addf %428, %429 : vector<8x128xf32>
    %cst_186 = arith.constant 0.000000e+00 : f32
    %431 = vector.broadcast %cst_186 : f32 to vector<8x128xf32>
    %432 = arith.maximumf %430, %431 : vector<8x128xf32>
    %433 = vector.broadcast %120 : f32 to vector<8x128xf32>
    %434 = arith.mulf %432, %433 : vector<8x128xf32>
    %435 = arith.addf %423, %434 : vector<8x128xf32>
    %436 = vector.broadcast %25 : f32 to vector<8x128xf32>
    %437 = arith.mulf %132, %436 : vector<8x128xf32>
    %438 = vector.broadcast %57 : f32 to vector<8x128xf32>
    %439 = arith.mulf %134, %438 : vector<8x128xf32>
    %440 = arith.addf %437, %439 : vector<8x128xf32>
    %441 = vector.broadcast %89 : f32 to vector<8x128xf32>
    %442 = arith.addf %440, %441 : vector<8x128xf32>
    %cst_187 = arith.constant 0.000000e+00 : f32
    %443 = vector.broadcast %cst_187 : f32 to vector<8x128xf32>
    %444 = arith.maximumf %442, %443 : vector<8x128xf32>
    %445 = vector.broadcast %121 : f32 to vector<8x128xf32>
    %446 = arith.mulf %444, %445 : vector<8x128xf32>
    %447 = arith.addf %435, %446 : vector<8x128xf32>
    %448 = vector.broadcast %26 : f32 to vector<8x128xf32>
    %449 = arith.mulf %132, %448 : vector<8x128xf32>
    %450 = vector.broadcast %58 : f32 to vector<8x128xf32>
    %451 = arith.mulf %134, %450 : vector<8x128xf32>
    %452 = arith.addf %449, %451 : vector<8x128xf32>
    %453 = vector.broadcast %90 : f32 to vector<8x128xf32>
    %454 = arith.addf %452, %453 : vector<8x128xf32>
    %cst_188 = arith.constant 0.000000e+00 : f32
    %455 = vector.broadcast %cst_188 : f32 to vector<8x128xf32>
    %456 = arith.maximumf %454, %455 : vector<8x128xf32>
    %457 = vector.broadcast %122 : f32 to vector<8x128xf32>
    %458 = arith.mulf %456, %457 : vector<8x128xf32>
    %459 = arith.addf %447, %458 : vector<8x128xf32>
    %460 = vector.broadcast %27 : f32 to vector<8x128xf32>
    %461 = arith.mulf %132, %460 : vector<8x128xf32>
    %462 = vector.broadcast %59 : f32 to vector<8x128xf32>
    %463 = arith.mulf %134, %462 : vector<8x128xf32>
    %464 = arith.addf %461, %463 : vector<8x128xf32>
    %465 = vector.broadcast %91 : f32 to vector<8x128xf32>
    %466 = arith.addf %464, %465 : vector<8x128xf32>
    %cst_189 = arith.constant 0.000000e+00 : f32
    %467 = vector.broadcast %cst_189 : f32 to vector<8x128xf32>
    %468 = arith.maximumf %466, %467 : vector<8x128xf32>
    %469 = vector.broadcast %123 : f32 to vector<8x128xf32>
    %470 = arith.mulf %468, %469 : vector<8x128xf32>
    %471 = arith.addf %459, %470 : vector<8x128xf32>
    %472 = vector.broadcast %28 : f32 to vector<8x128xf32>
    %473 = arith.mulf %132, %472 : vector<8x128xf32>
    %474 = vector.broadcast %60 : f32 to vector<8x128xf32>
    %475 = arith.mulf %134, %474 : vector<8x128xf32>
    %476 = arith.addf %473, %475 : vector<8x128xf32>
    %477 = vector.broadcast %92 : f32 to vector<8x128xf32>
    %478 = arith.addf %476, %477 : vector<8x128xf32>
    %cst_190 = arith.constant 0.000000e+00 : f32
    %479 = vector.broadcast %cst_190 : f32 to vector<8x128xf32>
    %480 = arith.maximumf %478, %479 : vector<8x128xf32>
    %481 = vector.broadcast %124 : f32 to vector<8x128xf32>
    %482 = arith.mulf %480, %481 : vector<8x128xf32>
    %483 = arith.addf %471, %482 : vector<8x128xf32>
    %484 = vector.broadcast %29 : f32 to vector<8x128xf32>
    %485 = arith.mulf %132, %484 : vector<8x128xf32>
    %486 = vector.broadcast %61 : f32 to vector<8x128xf32>
    %487 = arith.mulf %134, %486 : vector<8x128xf32>
    %488 = arith.addf %485, %487 : vector<8x128xf32>
    %489 = vector.broadcast %93 : f32 to vector<8x128xf32>
    %490 = arith.addf %488, %489 : vector<8x128xf32>
    %cst_191 = arith.constant 0.000000e+00 : f32
    %491 = vector.broadcast %cst_191 : f32 to vector<8x128xf32>
    %492 = arith.maximumf %490, %491 : vector<8x128xf32>
    %493 = vector.broadcast %125 : f32 to vector<8x128xf32>
    %494 = arith.mulf %492, %493 : vector<8x128xf32>
    %495 = arith.addf %483, %494 : vector<8x128xf32>
    %496 = vector.broadcast %30 : f32 to vector<8x128xf32>
    %497 = arith.mulf %132, %496 : vector<8x128xf32>
    %498 = vector.broadcast %62 : f32 to vector<8x128xf32>
    %499 = arith.mulf %134, %498 : vector<8x128xf32>
    %500 = arith.addf %497, %499 : vector<8x128xf32>
    %501 = vector.broadcast %94 : f32 to vector<8x128xf32>
    %502 = arith.addf %500, %501 : vector<8x128xf32>
    %cst_192 = arith.constant 0.000000e+00 : f32
    %503 = vector.broadcast %cst_192 : f32 to vector<8x128xf32>
    %504 = arith.maximumf %502, %503 : vector<8x128xf32>
    %505 = vector.broadcast %126 : f32 to vector<8x128xf32>
    %506 = arith.mulf %504, %505 : vector<8x128xf32>
    %507 = arith.addf %495, %506 : vector<8x128xf32>
    %508 = vector.broadcast %31 : f32 to vector<8x128xf32>
    %509 = arith.mulf %132, %508 : vector<8x128xf32>
    %510 = vector.broadcast %63 : f32 to vector<8x128xf32>
    %511 = arith.mulf %134, %510 : vector<8x128xf32>
    %512 = arith.addf %509, %511 : vector<8x128xf32>
    %513 = vector.broadcast %95 : f32 to vector<8x128xf32>
    %514 = arith.addf %512, %513 : vector<8x128xf32>
    %cst_193 = arith.constant 0.000000e+00 : f32
    %515 = vector.broadcast %cst_193 : f32 to vector<8x128xf32>
    %516 = arith.maximumf %514, %515 : vector<8x128xf32>
    %517 = vector.broadcast %127 : f32 to vector<8x128xf32>
    %518 = arith.mulf %516, %517 : vector<8x128xf32>
    %519 = arith.addf %507, %518 : vector<8x128xf32>
    %cst_194 = arith.constant -3.000000e+01 : f32
    %cst_195 = arith.constant 3.000000e+01 : f32
    %520 = vector.broadcast %cst_194 : f32 to vector<8x128xf32>
    %521 = arith.maximumf %520, %519 : vector<8x128xf32>
    %522 = vector.broadcast %cst_195 : f32 to vector<8x128xf32>
    %523 = arith.minimumf %522, %521 : vector<8x128xf32>
    %cst_196 = arith.constant 0.000000e+00 : f32
    %524 = vector.broadcast %cst_196 : f32 to vector<8x128xf32>
    %525 = arith.subf %524, %523 : vector<8x128xf32>
    %526 = math.exp %525 : vector<8x128xf32>
    %cst_197 = arith.constant 1.000000e+00 : f32
    %527 = vector.broadcast %cst_197 : f32 to vector<8x128xf32>
    %528 = arith.addf %527, %526 : vector<8x128xf32>
    %529 = tpu.reciprocal %528 {approx = true} : vector<8x128xf32> -> vector<8x128xf32>
    %530 = arith.mulf %528, %529 : vector<8x128xf32>
    %cst_198 = arith.constant 2.000000e+00 : f32
    %531 = vector.broadcast %cst_198 : f32 to vector<8x128xf32>
    %532 = arith.subf %531, %530 : vector<8x128xf32>
    %533 = arith.mulf %529, %532 : vector<8x128xf32>
    %534 = arith.index_cast %130 : i32 to index
    %c0_199 = arith.constant 0 : index
    %535 = vector.load %arg7[%534, %c0_199] : memref<8x128xf32, #tpu.memory_space<vmem>>, vector<8x128xf32>
    tpu.vector_store %arg7[%534, %c0_199], %533 {strides = array<i32>} : memref<8x128xf32, #tpu.memory_space<vmem>>, vector<8x128xf32>,
    %c1_i32 = arith.constant 1 : i32
    return
  }
  func.func @transform_0(%arg0: i32) -> (i32, i32) {
    %c0_i32 = arith.constant 0 : i32
    %c0_i32_0 = arith.constant 0 : i32
    return %arg0, %c0_i32 : i32, i32
  }
  func.func @transform_1(%arg0: i32) -> (i32, i32) {
    %c0_i32 = arith.constant 0 : i32
    %c0_i32_0 = arith.constant 0 : i32
    return %arg0, %c0_i32 : i32, i32
  }
  func.func @transform_2(%arg0: i32) -> (i32, i32) {
    %c0_i32 = arith.constant 0 : i32
    %c0_i32_0 = arith.constant 0 : i32
    %c0_i32_1 = arith.constant 0 : i32
    return %c0_i32, %c0_i32_0 : i32, i32
  }
  func.func @transform_3(%arg0: i32) -> i32 {
    %c0_i32 = arith.constant 0 : i32
    %c0_i32_0 = arith.constant 0 : i32
    return %c0_i32 : i32
  }
  func.func @transform_4(%arg0: i32) -> i32 {
    %c0_i32 = arith.constant 0 : i32
    %c0_i32_0 = arith.constant 0 : i32
    return %c0_i32 : i32
  }
  func.func @transform_5(%arg0: i32) -> i32 {
    %c0_i32 = arith.constant 0 : i32
    %c0_i32_0 = arith.constant 0 : i32
    return %c0_i32 : i32
  }
  func.func @transform_6(%arg0: i32) -> (i32, i32) {
    %c0_i32 = arith.constant 0 : i32
    %c0_i32_0 = arith.constant 0 : i32
    return %arg0, %c0_i32 : i32, i32
  }
}

</mosaic_0001>

<bundles_post_ra>
// kernel: tpu_custom_call.1
= control target key start
LH: loop header
LB: loop body
LE: loop exit
PB: predicated region body
PF: predicated region fallthrough
CT: control target
= control target key end

     0   :  { %12 = vsyncpa [#allocation4], 0  ;;  %s1514_s0 = inlined_call_operand.hbm [shape: f32[8,128], index: 0, kind: input, shape index: {}]   ;;  %s1515_s1 = inlined_call_operand.hbm [shape: f32[8,128], index: 1, kind: input, shape index: {}]   ;;  %s1516_s2 = inlined_call_operand.vmem [shape: f32[2,32], index: 2, kind: input, shape index: {}]   ;;  %s1517_s3 = inlined_call_operand.vmem [shape: f32[32], index: 3, kind: input, shape index: {}]   ;;  %s1518_s4 = inlined_call_operand.vmem [shape: f32[32], index: 4, kind: input, shape index: {}]   ;;  %s1519_s5 = inlined_call_operand.<no memory space> [shape: f32[1], index: 5, kind: input, shape index: {}]   ;;  %s1520_s6 = inlined_call_operand.hbm [shape: f32[8,128], index: 6, kind: output, shape index: {}]  }
   0x1   :  { %13 = vsyncpa [#allocation8], 0 }
   0x2   :  { %14 = vsyncpa [#allocation6], 0 }
   0x3   :  { %15 = vsyncpa [#allocation11], 0  ;;  %s53_s23 = sshll.u32 %s1517_s3, 4  ;;  %s54_s23 = int_to_ptr.vmem [resolvable:$true] %s53_s23 }
   0x4   :  { %16 = vsyncpa [#allocation5], 0  ;;  %s734_s24 = scalar_lea.vmem %s54_s23, 16  ;;  %p739_p1 = scmp.lt.s32.totalorder %s54_s23, %s54_s23 }
   0x5   :  { %p735_p0 = scmp.ne.s32.totalorder %s54_s23, %s734_s24  ;;  %p740_p2 = scmp.lt.s32.totalorder %s734_s24, %s734_s24 }
   0x7   :  { %p741_p3 = por %p740_p2, %p739_p1 }
   0x9   :  { %p742_p4 = pnand %p741_p3, %p735_p0 }
   0xb   :  { %745 = shalt.err (!%p742_p4)
}
   0xc   :  { %s846_s25 = smov [#allocation10]   ;;  %s847_s26 = smov [#allocation3]  }
   0xd   :  { %56 = dma.vmem_to_smem %s54_s23, 16, %s846_s25, [#allocation11]  }
   0xe   :  { %s23_s27 = sshll.u32 %s847_s26, 4  ;;  %s848_s28 = smov [#allocation7]   ;;  %s24_s27 = int_to_ptr.vmem [resolvable:$true] %s23_s27 }
   0xf   :  { %s33_s29 = sshll.u32 %s848_s28, 4  ;;  %s746_s3 = scalar_lea.hbm %s1514_s0, 128  ;;  %s34_s29 = int_to_ptr.vmem [resolvable:$true] %s33_s29 }
  0x10   :  { %p747_p5 = scmp.ne.s32.totalorder %s1514_s0, %s746_s3  ;;  %p750_p6 = scmp.lt.u32.totalorder %s746_s3, %s1514_s0 }
  0x12   :  { %p752_p7 = pnand %p750_p6, %p747_p5 }
  0x14   :  { %755 = shalt.err (!%p752_p7)
}
  0x15   :  { %s756_s12 = scalar_lea.vmem %s24_s27, 128  ;;  %p761_p9 = scmp.lt.s32.totalorder %s24_s27, %s24_s27 }
  0x16   :  { %p757_p8 = scmp.ne.s32.totalorder %s24_s27, %s756_s12  ;;  %p762_p10 = scmp.lt.s32.totalorder %s756_s12, %s756_s12 }
  0x18   :  { %p763_p11 = por %p762_p10, %p761_p9 }
  0x1a   :  { %p764_p12 = pnand %p763_p11, %p757_p8 }
  0x1c   :  { %767 = shalt.err (!%p764_p12)
}
  0x1d   :  { %26 = dma.hbm_to_vmem [thread:$0]  %s1514_s0, 128, %s24_s27, [#allocation4]  }
  0x1e   :  { %s43_s17 = sshll.u32 %s1516_s2, 4  ;;  %s768_s20 = scalar_lea.hbm %s1515_s1, 128  ;;  %s44_s17 = int_to_ptr.vmem [resolvable:$true] %s43_s17 }
  0x1f   :  { %p769_p13 = scmp.ne.s32.totalorder %s1515_s1, %s768_s20  ;;  %p772_p0 = scmp.lt.u32.totalorder %s768_s20, %s1515_s1 }
  0x21   :  { %p774_p1 = pnand %p772_p0, %p769_p13 }
  0x23   :  { %777 = shalt.err (!%p774_p1)
}
  0x24   :  { %s778_s0 = scalar_lea.vmem %s34_s29, 128  ;;  %p783_p3 = scmp.lt.s32.totalorder %s34_s29, %s34_s29 }
  0x25   :  { %p779_p2 = scmp.ne.s32.totalorder %s34_s29, %s778_s0  ;;  %p784_p4 = scmp.lt.s32.totalorder %s778_s0, %s778_s0 }
  0x27   :  { %p785_p5 = por %p784_p4, %p783_p3 }
  0x29   :  { %p786_p6 = pnand %p785_p5, %p779_p2 }
  0x2b   :  { %789 = shalt.err (!%p786_p6)
}
  0x2c   :  { %36 = dma.hbm_to_vmem [thread:$0]  %s1515_s1, 128, %s34_s29, [#allocation8]  }
  0x2d   :  { %s790_s26 = scalar_lea.vmem %s44_s17, 32  ;;  %p795_p8 = scmp.lt.s32.totalorder %s44_s17, %s44_s17 }
  0x2e   :  { %p791_p7 = scmp.ne.s32.totalorder %s44_s17, %s790_s26  ;;  %p796_p9 = scmp.lt.s32.totalorder %s790_s26, %s790_s26 }
  0x30   :  { %p797_p10 = por %p796_p9, %p795_p8 }
  0x32   :  { %p798_p11 = pnand %p797_p10, %p791_p7 }
  0x34   :  { %801 = shalt.err (!%p798_p11)
}
  0x35   :  { %s849_s27 = smov [#allocation9]   ;;  %s63_s7 = sshll.u32 %s1518_s4, 4  ;;  %s64_s7 = int_to_ptr.vmem [resolvable:$true] %s63_s7 }
  0x36   :  { %46 = dma.vmem_to_smem %s44_s17, 32, %s849_s27, [#allocation6]  }
  0x37   :  { %s802_s3 = scalar_lea.vmem %s64_s7, 16  ;;  %p807_p13 = scmp.lt.s32.totalorder %s64_s7, %s64_s7 }
  0x38   :  { %p803_p12 = scmp.ne.s32.totalorder %s64_s7, %s802_s3  ;;  %p808_p0 = scmp.lt.s32.totalorder %s802_s3, %s802_s3 }
  0x3a   :  { %p809_p1 = por %p808_p0, %p807_p13 }
  0x3c   :  { %p810_p2 = pnand %p809_p1, %p803_p12 }
  0x3e   :  { %813 = shalt.err (!%p810_p2)
}
  0x3f   :  { %s850_s1 = smov [#allocation12]  }
  0x40   :  { %66 = dma.vmem_to_smem %s64_s7, 16, %s850_s1, [#allocation11]  }
  0x41   :  { %836 = dma.done.wait [#allocation4], 128  }
  0x42   :  { %837 = vsyncadd [#allocation4], 4294967168 }
  0x43   :  { %838 = dma.done.wait [#allocation8], 128  }
  0x44   :  { %839 = vsyncadd [#allocation8], 4294967168 }
  0x45   :  { %840 = dma.done.wait [#allocation6], 32  }
  0x46   :  { %841 = vsyncadd [#allocation6], 4294967264 }
  0x47   :  { %842 = dma.done.wait [#allocation11], 32  }
  0x48   :  { %843 = vsyncadd [#allocation11], 4294967264 }
  0x49   :  { %84 = sfence }
  0x4a   :  { %s920_s4 = sld [smem:[#allocation9]]  ;;  %s922_s29 = sld [smem:[#allocation9 + $0x1]]  ;;  %v958_v0 = vld [vmem:[#allocation3] sm:$0xff]  ;;  %v216_v3 = vstv %s1519_s5  ;;  %v1094_v47 = vld [vmem:[#allocation7] sm:$0xff] }
  0x4b   :  { %s924_s8 = sld [smem:[#allocation9 + $0x2]]  ;;  %s926_s9 = sld [smem:[#allocation9 + $0x3]] }
  0x4c   :  { %s928_s10 = sld [smem:[#allocation9 + $0x4]]  ;;  %s930_s11 = sld [smem:[#allocation9 + $0x5]] }
  0x4d   :  { %s932_s12 = sld [smem:[#allocation9 + $0x6]]  ;;  %s934_s13 = sld [smem:[#allocation9 + $0x7]] }
  0x4e   :  { %s936_s14 = sld [smem:[#allocation9 + $0x8]]  ;;  %s938_s15 = sld [smem:[#allocation9 + $0x9]] }
  0x4f   :  { %s940_s16 = sld [smem:[#allocation9 + $0xa]]  ;;  %s942_s17 = sld [smem:[#allocation9 + $0xb]] }
  0x50   :  { %s944_s18 = sld [smem:[#allocation9 + $0xc]]  ;;  %s946_s19 = sld [smem:[#allocation9 + $0xd]]  ;;  %v217_v1 = vstv %s920_s4  ;;  %v228_v2 = vstv %s922_s29 }
  0x51   :  { %s948_s20 = sld [smem:[#allocation9 + $0xe]]  ;;  %s950_s21 = sld [smem:[#allocation9 + $0xf]]  ;;  %v239_v4 = vstv %s924_s8  ;;  %v250_v5 = vstv %s926_s9  ;;  %v981_v7 = vmul.f32 %v217_v1, %v958_v0  ;;  %v991_v11 = vmul.f32 %v228_v2, %v958_v0 }
  0x52   :  { %s952_s22 = sld [smem:[#allocation9 + $0x10]]  ;;  %s954_s23 = sld [smem:[#allocation9 + $0x11]]  ;;  %v261_v6 = vstv %s928_s10  ;;  %v272_v8 = vstv %s930_s11  ;;  %v1001_v15 = vmul.f32 %v239_v4, %v958_v0  ;;  %v1004_v16 = vmul.f32 %v250_v5, %v958_v0 }
  0x53   :  { %s956_s24 = sld [smem:[#allocation9 + $0x12]]  ;;  %s961_s0 = sld [smem:[#allocation9 + $0x13]]  ;;  %v283_v9 = vstv %s932_s12  ;;  %v294_v10 = vstv %s934_s13  ;;  %v1007_v17 = vmul.f32 %v261_v6, %v958_v0  ;;  %v1015_v19 = vmul.f32 %v272_v8, %v958_v0 }
  0x54   :  { %s963_s2 = sld [smem:[#allocation9 + $0x14]]  ;;  %s966_s25 = sld [smem:[#allocation9 + $0x15]]  ;;  %v305_v12 = vstv %s936_s14  ;;  %v316_v13 = vstv %s938_s15  ;;  %v1018_v20 = vmul.f32 %v283_v9, %v958_v0  ;;  %v1021_v21 = vmul.f32 %v294_v10, %v958_v0 }
  0x55   :  { %s968_s26 = sld [smem:[#allocation9 + $0x16]]  ;;  %s976_s30 = sld [smem:[#allocation9 + $0x17]]  ;;  %v327_v14 = vstv %s940_s16  ;;  %v338_v18 = vstv %s942_s17  ;;  %v1029_v23 = vmul.f32 %v305_v12, %v958_v0  ;;  %v1032_v24 = vmul.f32 %v316_v13, %v958_v0 }
  0x56   :  { %s978_s7 = sld [smem:[#allocation9 + $0x18]]  ;;  %s986_s3 = sld [smem:[#allocation9 + $0x19]]  ;;  %v349_v22 = vstv %s944_s18  ;;  %v1035_v25 = vmul.f32 %v327_v14, %v958_v0  ;;  %v360_v26 = vstv %s946_s19  ;;  %v1043_v27 = vmul.f32 %v338_v18, %v958_v0 }
  0x57   :  { %s988_s1 = sld [smem:[#allocation9 + $0x1a]]  ;;  %s996_s4 = sld [smem:[#allocation9 + $0x1b]]  ;;  %v371_v28 = vstv %s948_s20  ;;  %v382_v29 = vstv %s950_s21  ;;  %v1051_v31 = vmul.f32 %v349_v22, %v958_v0  ;;  %v1059_v35 = vmul.f32 %v360_v26, %v958_v0 }
  0x58   :  { %s998_s29 = sld [smem:[#allocation9 + $0x80]]  ;;  %s1010_s8 = sld [smem:[#allocation9 + $0x1c]]  ;;  %v393_v30 = vstv %s952_s22  ;;  %v404_v32 = vstv %s954_s23  ;;  %v1067_v39 = vmul.f32 %v371_v28, %v958_v0  ;;  %v1070_v40 = vmul.f32 %v382_v29, %v958_v0 }
  0x59   :  { %s1012_s9 = sld [smem:[#allocation9 + $0x81]]  ;;  %s1024_s10 = sld [smem:[#allocation9 + $0x1d]]  ;;  %v415_v33 = vstv %s956_s24  ;;  %v426_v34 = vstv %s961_s0  ;;  %v1073_v41 = vmul.f32 %v393_v30, %v958_v0  ;;  %v1081_v43 = vmul.f32 %v404_v32, %v958_v0 }
  0x5a   :  { %s1026_s11 = sld [smem:[#allocation9 + $0x82]]  ;;  %s1038_s12 = sld [smem:[#allocation9 + $0x1e]]  ;;  %v437_v36 = vstv %s963_s2  ;;  %v448_v37 = vstv %s966_s25  ;;  %v1084_v44 = vmul.f32 %v415_v33, %v958_v0  ;;  %v1087_v45 = vmul.f32 %v426_v34, %v958_v0 }
  0x5b   :  { %s1040_s13 = sld [smem:[#allocation9 + $0x1f]]  ;;  %s1048_s14 = sld [smem:[#allocation9 + $0x83]]  ;;  %v459_v38 = vstv %s968_s26  ;;  %v470_v42 = vstv %s976_s30  ;;  %v1098_v49 = vmul.f32 %v437_v36, %v958_v0  ;;  %v1101_v50 = vmul.f32 %v448_v37, %v958_v0 }
  0x5c   :  { %s1056_s15 = sld [smem:[#allocation9 + $0x84]]  ;;  %s1064_s16 = sld [smem:[#allocation9 + $0x85]]  ;;  %v481_v46 = vstv %s978_s7  ;;  %v1104_v51 = vmul.f32 %v459_v38, %v958_v0  ;;  %v1112_v53 = vmul.f32 %v470_v42, %v958_v0  ;;  %v492_v54 = vstv %s986_s3 }
  0x5d   :  { %s1076_s17 = sld [smem:[#allocation9 + $0x86]]  ;;  %s1078_s18 = sld [smem:[#allocation9 + $0x87]]  ;;  %v503_v55 = vstv %s988_s1  ;;  %v1122_v57 = vmul.f32 %v481_v46, %v958_v0  ;;  %v514_v58 = vstv %s996_s4  ;;  %v1137_v4 = vmul.f32 %v492_v54, %v958_v0 }
  0x5e   :  { %s1090_s19 = sld [smem:[#allocation9 + $0x88]]  ;;  %s1092_s20 = sld [smem:[#allocation9 + $0x89]]  ;;  %v219_v48 = vstv %s998_s29  ;;  %v525_v59 = vstv %s1010_s8  ;;  %v1140_v5 = vmul.f32 %v503_v55, %v958_v0  ;;  %v1149_v9 = vmul.f32 %v514_v58, %v958_v0 }
  0x5f   :  { %s1106_s21 = sld [smem:[#allocation9 + $0x8a]]  ;;  %s1108_s22 = sld [smem:[#allocation9 + $0x8b]]  ;;  %v230_v52 = vstv %s1012_s9  ;;  %v220_v60 = vmul.f32 %v219_v48, %v1094_v47  ;;  %v536_v61 = vstv %s1024_s10  ;;  %v1152_v10 = vmul.f32 %v525_v59, %v958_v0 }
  0x60   :  { %s1116_s23 = sld [smem:[#allocation9 + $0x8c]]  ;;  %s1118_s24 = sld [smem:[#allocation9 + $0x8d]]  ;;  %v241_v56 = vstv %s1026_s11  ;;  %v547_v62 = vstv %s1038_s12  ;;  %v231_v1 = vmul.f32 %v230_v52, %v1094_v47  ;;  %v1156_v13 = vmul.f32 %v536_v61, %v958_v0 }
  0x61   :  { %s1126_s0 = sld [smem:[#allocation10]]  ;;  %s1128_s2 = sld [smem:[#allocation10 + $0x1]]  ;;  %v558_v63 = vstv %s1040_s13  ;;  %v252_v2 = vstv %s1048_s14  ;;  %v242_v6 = vmul.f32 %v241_v56, %v1094_v47  ;;  %v1159_v14 = vmul.f32 %v547_v62, %v958_v0 }
  0x62   :  { %s1142_s25 = sld [smem:[#allocation9 + $0x8e]]  ;;  %s1144_s26 = sld [smem:[#allocation10 + $0x2]]  ;;  %v263_v8 = vstv %s1056_s15  ;;  %v274_v12 = vstv %s1064_s16  ;;  %v1162_v18 = vmul.f32 %v558_v63, %v958_v0  ;;  %v221_v22 = vadd.f32 %v220_v60, %v981_v7 }
  0x63   :  { %s1164_s27 = sld [smem:[#allocation10 + $0x3]]  ;;  %v253_v26 = vmul.f32 %v252_v2, %v1094_v47  ;;  %v285_v28 = vstv %s1076_s17  ;;  %v296_v29 = vstv %s1078_s18  ;;  %s1170_s28 = sld [smem:[#allocation9 + $0x8f]]  ;;  %v232_v30 = vadd.f32 %v231_v1, %v991_v11 }
  0x64   :  { %v264_v32 = vmul.f32 %v263_v8, %v1094_v47  ;;  %v307_v33 = vstv %s1090_s19  ;;  %v318_v0 = vstv %s1092_s20  ;;  %s1176_s30 = sld [smem:[#allocation10 + $0x4]]  ;;  %v243_v7 = vadd.f32 %v242_v6, %v1001_v15  ;;  %s1182_s7 = sld [smem:[#allocation9 + $0x90]] }
  0x65   :  { %v275_v34 = vmul.f32 %v274_v12, %v1094_v47  ;;  %v329_v36 = vstv %s1106_s21  ;;  %v340_v37 = vstv %s1108_s22  ;;  %s1184_s3 = sld [smem:[#allocation10 + $0x5]]  ;;  %v286_v11 = vmul.f32 %v285_v28, %v1094_v47  ;;  %s1190_s1 = sld [smem:[#allocation9 + $0x91]] }
  0x66   :  { %v297_v38 = vmul.f32 %v296_v29, %v1094_v47  ;;  %v351_v42 = vstv %s1116_s23  ;;  %v362_v46 = vstv %s1118_s24  ;;  %s1192_s4 = sld [smem:[#allocation9 + $0x92]]  ;;  %v308_v52 = vmul.f32 %v307_v33, %v1094_v47  ;;  %s1198_s29 = sld [smem:[#allocation9 + $0x93]] }
  0x67   :  { %v222_v15 = vstv %s1126_s0  ;;  %v233_v48 = vstv %s1128_s2  ;;  %v319_v54 = vmul.f32 %v318_v0, %v1094_v47  ;;  %v254_v55 = vadd.f32 %v253_v26, %v1004_v16  ;;  %s1204_s8 = sld [smem:[#allocation10 + $0x6]]  ;;  %s1210_s9 = sld [smem:[#allocation10 + $0x7]] }
  0x68   :  { %v265_v56 = vadd.f32 %v264_v32, %v1007_v17  ;;  %v330_v58 = vmul.f32 %v329_v36, %v1094_v47  ;;  %v341_v59 = vmul.f32 %v340_v37, %v1094_v47  ;;  %v244_v60 = vstv %s1144_s26  ;;  %s1214_s10 = sld [smem:[#allocation12]]  ;;  %s1216_s11 = sld [smem:[#allocation12 + $0x1]] }
  0x69   :  { %v352_v61 = vmul.f32 %v351_v42, %v1094_v47  ;;  %v363_v62 = vmul.f32 %v362_v46, %v1094_v47  ;;  %v373_v63 = vstv %s1142_s25  ;;  %v223_v1 = vadd.f32 %v222_v15, %v221_v22  ;;  %s1226_s12 = sld [smem:[#allocation12 + $0x2]]  ;;  %s1228_s13 = sld [smem:[#allocation12 + $0x3]] }
  0x6a   :  { %v234_v16 = vadd.f32 %v233_v48, %v232_v30  ;;  %v276_v2 = vadd.f32 %v275_v34, %v1015_v19  ;;  %v287_v17 = vadd.f32 %v286_v11, %v1018_v20  ;;  %v255_v6 = vstv %s1164_s27  ;;  %s1235_s14 = sld [smem:[#allocation10 + $0x8]]  ;;  %s1237_s15 = sld [smem:[#allocation12 + $0x4]] }
  0x6b   :  { %v298_v8 = vadd.f32 %v297_v38, %v1021_v21  ;;  %v1221_v12 = vadd.f32 %v308_v52, %v1029_v23  ;;  %v1224_v26 = vadd.f32 %v319_v54, %v1032_v24  ;;  %v245_v19 = vadd.f32 %v244_v60, %v243_v7  ;;  %s1249_s16 = sld [smem:[#allocation10 + $0x9]]  ;;  %s1252_s17 = sld [smem:[#allocation10 + $0xa]] }
  0x6c   :  { %v1231_v20 = vadd.f32 %v330_v58, %v1035_v25  ;;  %v374_v22 = vmul.f32 %v373_v63, %v1094_v47  ;;  %v384_v28 = vstv %s1170_s28  ;;  %v266_v21 = vstv %s1176_s30  ;;  %s1254_s18 = sld [smem:[#allocation12 + $0x5]]  ;;  %s1260_s19 = sld [smem:[#allocation9 + $0x94]] }
  0x6d   :  { %v1241_v23 = vadd.f32 %v341_v59, %v1043_v27  ;;  %v1244_v24 = vadd.f32 %v352_v61, %v1051_v31  ;;  %v1247_v25 = vadd.f32 %v363_v62, %v1059_v35  ;;  %v224_v29 = vmax.f32 %v223_v1, 0.0  ;;  %s1266_s20 = sld [smem:[#allocation9 + $0x95]]  ;;  %s1268_s21 = sld [smem:[#allocation12 + $0x6]] }
  0x6e   :  { %v235_v30 = vmax.f32 %v234_v16, 0.0  ;;  %v256_v32 = vadd.f32 %v255_v6, %v254_v55  ;;  %v277_v33 = vstv %s1184_s3  ;;  %v385_v27 = vmul.f32 %v384_v28, %v1094_v47  ;;  %s1273_s22 = sld [smem:[#allocation10 + $0xb]]  ;;  %s1276_s23 = sld [smem:[#allocation12 + $0x7]] }
  0x6f   :  { %v395_v31 = vstv %s1182_s7  ;;  %v406_v0 = vstv %s1190_s1  ;;  %v417_v35 = vstv %s1192_s4  ;;  %v246_v7 = vmax.f32 %v245_v19, 0.0  ;;  %s1284_s24 = sld [smem:[#allocation10 + $0xc]]  ;;  %s1290_s25 = sld [smem:[#allocation10 + $0xd]] }
  0x70   :  { %v267_v34 = vadd.f32 %v266_v21, %v265_v56  ;;  %v1263_v36 = vadd.f32 %v374_v22, %v1067_v39  ;;  %v428_v37 = vstv %s1198_s29  ;;  %v225_v11 = vstv %s1214_s10  ;;  %s1292_s26 = sld [smem:[#allocation12 + $0x8]]  ;;  %s1297_s27 = sld [smem:[#allocation10 + $0xe]] }
  0x71   :  { %v236_v38 = vstv %s1216_s11  ;;  %v278_v42 = vadd.f32 %v277_v33, %v276_v2  ;;  %v288_v46 = vstv %s1204_s8  ;;  %v226_v15 = vmul.f32 %v225_v11, %v224_v29  ;;  %s1299_s5 = sld [smem:[#allocation10 + $0xf]]  ;;  %s1302_s28 = sld [smem:[#allocation12 + $0x9]] }
  0x72   :  { %v237_v48 = vmul.f32 %v236_v38, %v235_v30  ;;  %v247_v52 = vstv %s1226_s12  ;;  %v257_v54 = vmax.f32 %v256_v32, 0.0  ;;  %v258_v39 = vstv %s1228_s13  ;;  %s1313_s30 = sld [smem:[#allocation12 + $0xa]]  ;;  %s1319_s7 = sld [smem:[#allocation10 + $0x10]] }
  0x73   :  { %v299_v55 = vstv %s1210_s9  ;;  %v1281_v56 = vadd.f32 %v385_v27, %v1070_v40  ;;  %v396_v58 = vmul.f32 %v395_v31, %v1094_v47  ;;  %v227_v59 = vadd.f32 %v226_v15, %v216_v3  ;;  %s1321_s3 = sld [smem:[#allocation10 + $0x11]]  ;;  %s1324_s1 = sld [smem:[#allocation12 + $0xb]] }
  0x74   :  { %v248_v60 = vmul.f32 %v247_v52, %v246_v7  ;;  %v268_v61 = vmax.f32 %v267_v34, 0.0  ;;  %v289_v62 = vadd.f32 %v288_v46, %v287_v17  ;;  %v269_v40 = vstv %s1237_s15  ;;  %s1330_s4 = sld [smem:[#allocation10 + $0x12]]  ;;  %s1332_s29 = sld [smem:[#allocation10 + $0x13]] }
  0x75   :  { %v279_v63 = vmax.f32 %v278_v42, 0.0  ;;  %v310_v1 = vstv %s1235_s14  ;;  %v407_v16 = vmul.f32 %v406_v0, %v1094_v47  ;;  %v238_v3 = vadd.f32 %v237_v48, %v227_v59  ;;  %s1335_s8 = sld [smem:[#allocation12 + $0xc]]  ;;  %s1342_s9 = sld [smem:[#allocation12 + $0xd]] }
  0x76   :  { %v259_v2 = vmul.f32 %v258_v39, %v257_v54  ;;  %v300_v6 = vadd.f32 %v299_v55, %v298_v8  ;;  %v321_v17 = vstv %s1249_s16  ;;  %v280_v19 = vstv %s1254_s18  ;;  %s1348_s10 = sld [smem:[#allocation9 + $0x96]]  ;;  %s1350_s11 = sld [smem:[#allocation10 + $0x14]] }
  0x77   :  { %v332_v22 = vstv %s1252_s17  ;;  %v1307_v28 = vmul.f32 %v417_v35, %v1094_v47  ;;  %v1310_v21 = vmul.f32 %v428_v37, %v1094_v47  ;;  %v249_v29 = vadd.f32 %v248_v60, %v238_v3  ;;  %s1353_s12 = sld [smem:[#allocation12 + $0xe]]  ;;  %s1360_s13 = sld [smem:[#allocation9 + $0x97]] }
  0x78   :  { %v270_v30 = vmul.f32 %v269_v40, %v268_v61  ;;  %v290_v32 = vmax.f32 %v289_v62, 0.0  ;;  %v311_v33 = vadd.f32 %v310_v1, %v1221_v12  ;;  %v291_v8 = vstv %s1268_s21  ;;  %s1362_s14 = sld [smem:[#allocation12 + $0xf]]  ;;  %s1366_s15 = sld [smem:[#allocation10 + $0x15]] }
  0x79   :  { %v322_v27 = vadd.f32 %v321_v17, %v1224_v26  ;;  %v439_v31 = vstv %s1260_s19  ;;  %v450_v0 = vstv %s1266_s20  ;;  %v260_v35 = vadd.f32 %v259_v2, %v249_v29  ;;  %s1368_s16 = sld [smem:[#allocation12 + $0x10]]  ;;  %s1377_s18 = sld [smem:[#allocation12 + $0x11]] }
  0x7a   :  { %v281_v7 = vmul.f32 %v280_v19, %v279_v63  ;;  %v301_v34 = vmax.f32 %v300_v6, 0.0  ;;  %v343_v37 = vstv %s1273_s22  ;;  %v302_v12 = vstv %s1276_s23  ;;  %s1375_s17 = sld [smem:[#allocation9 + $0x98]]  ;;  %s1381_s19 = sld [smem:[#allocation12 + $0x12]] }
  0x7b   :  { %v333_v11 = vadd.f32 %v332_v22, %v1231_v20  ;;  %v397_v26 = vadd.f32 %v396_v58, %v1073_v41  ;;  %v408_v38 = vadd.f32 %v407_v16, %v1081_v43  ;;  %v271_v42 = vadd.f32 %v270_v30, %v260_v35  ;;  %s1384_s20 = sld [smem:[#allocation9 + $0x99]]  ;;  %s1386_s21 = sld [smem:[#allocation12 + $0x13]] }
  0x7c   :  { %v292_v46 = vmul.f32 %v291_v8, %v290_v32  ;;  %v312_v15 = vmax.f32 %v311_v33, 0.0  ;;  %v354_v48 = vstv %s1284_s24  ;;  %v313_v52 = vstv %s1292_s26  ;;  %s1391_s22 = sld [smem:[#allocation10 + $0x16]]  ;;  %s1395_s23 = sld [smem:[#allocation9 + $0x9a]] }
  0x7d   :  { %v323_v54 = vmax.f32 %v322_v27, 0.0  ;;  %v344_v20 = vadd.f32 %v343_v37, %v1241_v23  ;;  %v365_v39 = vstv %s1290_s25  ;;  %v282_v41 = vadd.f32 %v281_v7, %v271_v42  ;;  %s1399_s24 = sld [smem:[#allocation10 + $0x17]]  ;;  %s1401_s0 = sld [smem:[#allocation12 + $0x14]] }
  0x7e   :  { %v303_v55 = vmul.f32 %v302_v12, %v301_v34  ;;  %v376_v43 = vstv %s1297_s27  ;;  %v387_v58 = vstv %s1299_s5  ;;  %v324_v59 = vstv %s1302_s28  ;;  %s1405_s2 = sld [smem:[#allocation9 + $0x9b]]  ;;  %s1407_s25 = sld [smem:[#allocation12 + $0x15]] }
  0x7f   :  { %v355_v60 = vadd.f32 %v354_v48, %v1244_v24  ;;  %v440_v61 = vmul.f32 %v439_v31, %v1094_v47  ;;  %v451_v62 = vmul.f32 %v450_v0, %v1094_v47  ;;  %v293_v23 = vadd.f32 %v292_v46, %v282_v41  ;;  %s1412_s26 = sld [smem:[#allocation10 + $0x18]]  ;;  %s1416_s27 = sld [smem:[#allocation9 + $0x9c]] }
  0x80   :  { %v314_v40 = vmul.f32 %v313_v52, %v312_v15  ;;  %v334_v63 = vmax.f32 %v333_v11, 0.0  ;;  %v366_v1 = vadd.f32 %v365_v39, %v1247_v25  ;;  %v335_v16 = vstv %s1313_s30  ;;  %s1418_s5 = sld [smem:[#allocation12 + $0x16]]  ;;  %s1422_s28 = sld [smem:[#allocation10 + $0x19]] }
  0x81   :  { %v345_v24 = vmax.f32 %v344_v20, 0.0  ;;  %v377_v3 = vadd.f32 %v376_v43, %v1263_v36  ;;  %v1358_v2 = vadd.f32 %v387_v58, %v1281_v56  ;;  %v304_v6 = vadd.f32 %v303_v55, %v293_v23  ;;  %s1426_s30 = sld [smem:[#allocation9 + $0x9d]] }
  0x82   :  { %v325_v17 = vmul.f32 %v324_v59, %v323_v54  ;;  %v398_v19 = vstv %s1319_s7  ;;  %v409_v25 = vstv %s1321_s3  ;;  %v346_v22 = vstv %s1324_s1  ;;  %s1428_s7 = sld [smem:[#allocation12 + $0x17]]  ;;  %s1433_s3 = sld [smem:[#allocation9 + $0x9e]] }
  0x83   :  { %v356_v36 = vmax.f32 %v355_v60, 0.0  ;;  %v419_v56 = vadd.f32 %v1307_v28, %v1084_v44  ;;  %v430_v29 = vadd.f32 %v1310_v21, %v1087_v45  ;;  %v315_v30 = vadd.f32 %v314_v40, %v304_v6  ;;  %s1435_s1 = sld [smem:[#allocation10 + $0x1a]] }
  0x84   :  { %v336_v32 = vmul.f32 %v335_v16, %v334_v63  ;;  %v420_v33 = vstv %s1330_s4  ;;  %v431_v8 = vstv %s1332_s29  ;;  %v357_v27 = vstv %s1335_s8  ;;  %s1440_s4 = sld [smem:[#allocation12 + $0x18]]  ;;  %s1444_s29 = sld [smem:[#allocation9 + $0x9f]] }
  0x85   :  { %v367_v31 = vmax.f32 %v366_v1, 0.0  ;;  %v399_v0 = vadd.f32 %v398_v19, %v397_v26  ;;  %v410_v44 = vadd.f32 %v409_v25, %v408_v38  ;;  %v326_v45 = vadd.f32 %v325_v17, %v315_v30  ;;  %s1446_s8 = sld [smem:[#allocation10 + $0x1b]] }
  0x86   :  { %v347_v28 = vmul.f32 %v346_v22, %v345_v24  ;;  %v378_v21 = vmax.f32 %v377_v3, 0.0  ;;  %v389_v35 = vmax.f32 %v1358_v2, 0.0  ;;  %v368_v7 = vstv %s1342_s9  ;;  %s1453_s9 = sld [smem:[#allocation10 + $0x1c]] }
  0x87   :  { %v421_v34 = vadd.f32 %v420_v33, %v419_v56  ;;  %v432_v37 = vadd.f32 %v431_v8, %v430_v29  ;;  %v441_v12 = vadd.f32 %v440_v61, %v1098_v49  ;;  %v337_v11 = vadd.f32 %v336_v32, %v326_v45 }
  0x88   :  { %v358_v26 = vmul.f32 %v357_v27, %v356_v36  ;;  %v442_v38 = vstv %s1350_s11  ;;  %v461_v42 = vstv %s1348_s10  ;;  %v379_v46 = vstv %s1353_s12  ;;  %s1455_s10 = sld [smem:[#allocation12 + $0x19]]  ;;  %s1462_s11 = sld [smem:[#allocation10 + $0x1d]] }
  0x89   :  { %v400_v15 = vmax.f32 %v399_v0, 0.0  ;;  %v411_v48 = vmax.f32 %v410_v44, 0.0  ;;  %v452_v52 = vadd.f32 %v451_v62, %v1101_v50  ;;  %v348_v49 = vadd.f32 %v347_v28, %v337_v11  ;;  %s1468_s12 = sld [smem:[#allocation10 + $0x1e]] }
  0x8a   :  { %v369_v54 = vmul.f32 %v368_v7, %v367_v31  ;;  %v390_v20 = vstv %s1362_s14  ;;  %v472_v39 = vstv %s1360_s13  ;;  %v401_v41 = vstv %s1368_s16  ;;  %s1470_s13 = sld [smem:[#allocation12 + $0x1a]]  ;;  %s1477_s14 = sld [smem:[#allocation10 + $0x1f]] }
  0x8b   :  { %v422_v55 = vmax.f32 %v421_v34, 0.0  ;;  %v453_v43 = vstv %s1366_s15  ;;  %v462_v50 = vmul.f32 %v461_v42, %v1094_v47  ;;  %v359_v58 = vadd.f32 %v358_v26, %v348_v49  ;;  %s1479_s15 = sld [smem:[#allocation12 + $0x1b]]  ;;  %s1485_s16 = sld [smem:[#allocation12 + $0x1c]] }
  0x8c   :  { %v380_v59 = vmul.f32 %v379_v46, %v378_v21  ;;  %v412_v60 = vstv %s1377_s18  ;;  %v483_v61 = vstv %s1375_s17  ;;  %v391_v62 = vmul.f32 %v390_v20, %v389_v35  ;;  %s1491_s17 = sld [smem:[#allocation12 + $0x1d]]  ;;  %s721_s18 = sld [smem:[#allocation12 + $0x1e]] }
  0x8d   :  { %v423_v23 = vstv %s1381_s19  ;;  %v433_v40 = vmax.f32 %v432_v37, 0.0  ;;  %v473_v63 = vmul.f32 %v472_v39, %v1094_v47  ;;  %v370_v1 = vadd.f32 %v369_v54, %v359_v58  ;;  %s722_s19 = sld [smem:[#allocation12 + $0x1f]] }
  0x8e   :  { %v434_v16 = vstv %s1386_s21  ;;  %v443_v24 = vadd.f32 %v442_v38, %v441_v12  ;;  %v494_v3 = vstv %s1384_s20  ;;  %v402_v2 = vmul.f32 %v401_v41, %v400_v15  ;;  %s851_s20 = smov [#allocation13]  }
  0x8f   :  { %v413_v6 = vmul.f32 %v412_v60, %v411_v48  ;;  %v463_v17 = vadd.f32 %v462_v50, %v1104_v51  ;;  %v484_v19 = vmul.f32 %v483_v61, %v1094_v47  ;;  %v381_v25 = vadd.f32 %v380_v59, %v370_v1  ;;  %s586_s21 = sshll.u32 %s851_s20, 4  ;;  %s587_s21 = int_to_ptr.vmem [resolvable:$true] %s586_s21 }
  0x90   :  { %v424_v22 = vmul.f32 %v423_v23, %v422_v55  ;;  %v454_v36 = vadd.f32 %v453_v43, %v452_v52  ;;  %v464_v56 = vstv %s1391_s22  ;;  %v435_v29 = vmul.f32 %v434_v16, %v433_v40  ;;  %s814_s22 = scalar_lea.vmem %s587_s21, 128  ;;  %p819_p4 = scmp.lt.s32.totalorder %s587_s21, %s587_s21 }
  0x91   :  { %v474_v30 = vadd.f32 %v473_v63, %v1112_v53  ;;  %v495_v32 = vmul.f32 %v494_v3, %v1094_v47  ;;  %v505_v51 = vstv %s1395_s23  ;;  %v392_v33 = vadd.f32 %v391_v62, %v381_v25  ;;  %p815_p3 = scmp.ne.s32.totalorder %s587_s21, %s814_s22  ;;  %p820_p5 = scmp.lt.s32.totalorder %s814_s22, %s814_s22 }
  0x92   :  { %v444_v8 = vmax.f32 %v443_v24, 0.0  ;;  %v445_v27 = vstv %s1401_s0  ;;  %v475_v31 = vstv %s1399_s24  ;;  %v456_v0 = vstv %s1407_s25 }
  0x93   :  { %v465_v44 = vadd.f32 %v464_v56, %v463_v17  ;;  %v485_v53 = vadd.f32 %v484_v19, %v1122_v57  ;;  %v516_v45 = vstv %s1405_s2  ;;  %v403_v28 = vadd.f32 %v402_v2, %v392_v33  ;;  %p821_p6 = por %p820_p5, %p819_p4 }
  0x94   :  { %v455_v21 = vmax.f32 %v454_v36, 0.0  ;;  %v486_v35 = vstv %s1412_s26  ;;  %v506_v7 = vmul.f32 %v505_v51, %v1094_v47  ;;  %v467_v34 = vstv %s1418_s5 }
  0x95   :  { %v476_v37 = vadd.f32 %v475_v31, %v474_v30  ;;  %v496_v12 = vadd.f32 %v495_v32, %v1137_v4  ;;  %v527_v11 = vstv %s1416_s27  ;;  %v414_v26 = vadd.f32 %v413_v6, %v403_v28  ;;  %p822_p7 = pnand %p821_p6, %p815_p3 }
  0x96   :  { %v446_v38 = vmul.f32 %v445_v27, %v444_v8  ;;  %v497_v57 = vstv %s1422_s28  ;;  %v517_v42 = vmul.f32 %v516_v45, %v1094_v47  ;;  %v466_v46 = vmax.f32 %v465_v44, 0.0 }
  0x97   :  { %v478_v15 = vstv %s1428_s7  ;;  %v487_v48 = vadd.f32 %v486_v35, %v485_v53  ;;  %v538_v52 = vstv %s1426_s30  ;;  %v425_v49 = vadd.f32 %v424_v22, %v414_v26 }
  0x98   :  { %v457_v54 = vmul.f32 %v456_v0, %v455_v21  ;;  %v507_v20 = vadd.f32 %v506_v7, %v1140_v5  ;;  %v528_v4 = vmul.f32 %v527_v11, %v1094_v47  ;;  %v477_v39 = vmax.f32 %v476_v37, 0.0 }
  0x99   :  { %v498_v41 = vadd.f32 %v497_v57, %v496_v12  ;;  %v508_v55 = vstv %s1435_s1  ;;  %v549_v43 = vstv %s1433_s3  ;;  %v436_v50 = vadd.f32 %v435_v29, %v425_v49 }
  0x9a   :  { %v489_v58 = vstv %s1440_s4  ;;  %v518_v59 = vadd.f32 %v517_v42, %v1149_v9  ;;  %v539_v5 = vmul.f32 %v538_v52, %v1094_v47  ;;  %v468_v60 = vmul.f32 %v467_v34, %v466_v46 }
  0x9b   :  { %v488_v61 = vmax.f32 %v487_v48, 0.0  ;;  %v519_v62 = vstv %s1446_s8  ;;  %v560_v23 = vstv %s1444_s29  ;;  %v447_v40 = vadd.f32 %v446_v38, %v436_v50 }
  0x9c   :  { %v509_v63 = vadd.f32 %v508_v55, %v507_v20  ;;  %v529_v1 = vadd.f32 %v528_v4, %v1152_v10  ;;  %v550_v16 = vmul.f32 %v549_v43, %v1094_v47  ;;  %v479_v9 = vmul.f32 %v478_v15, %v477_v39 }
  0x9d   :  { %v499_v24 = vmax.f32 %v498_v41, 0.0  ;;  %v500_v3 = vstv %s1455_s10  ;;  %v530_v2 = vstv %s1453_s9  ;;  %v458_v6 = vadd.f32 %v457_v54, %v447_v40 }
  0x9e   :  { %v520_v17 = vadd.f32 %v519_v62, %v518_v59  ;;  %v540_v19 = vadd.f32 %v539_v5, %v1156_v13  ;;  %v561_v25 = vmul.f32 %v560_v23, %v1094_v47  ;;  %v490_v10 = vmul.f32 %v489_v58, %v488_v61 }
  0x9f   :  { %v541_v22 = vstv %s1462_s11  ;;  %v469_v36 = vadd.f32 %v468_v60, %v458_v6  ;;  %v510_v56 = vmax.f32 %v509_v63, 0.0  ;;  %v531_v29 = vadd.f32 %v530_v2, %v529_v1 }
  0xa0   :  { %v551_v30 = vadd.f32 %v550_v16, %v1159_v14  ;;  %v501_v32 = vmul.f32 %v500_v3, %v499_v24  ;;  %v511_v51 = vstv %s1470_s13  ;;  %v552_v33 = vstv %s1468_s12 }
  0xa1   :  { %v480_v8 = vadd.f32 %v479_v9, %v469_v36  ;;  %v521_v13 = vmax.f32 %v520_v17, 0.0  ;;  %v542_v47 = vadd.f32 %v541_v22, %v540_v19  ;;  %v562_v27 = vadd.f32 %v561_v25, %v1162_v18 }
  0xa2   :  { %v522_v31 = vstv %s1479_s15  ;;  %v563_v0 = vstv %s1477_s14  ;;  %v512_v53 = vmul.f32 %v511_v51, %v510_v56  ;;  %v532_v45 = vmax.f32 %v531_v29, 0.0 }
  0xa3   :  { %v491_v44 = vadd.f32 %v490_v10, %v480_v8  ;;  %v553_v28 = vadd.f32 %v552_v33, %v551_v30  ;;  %v533_v21 = vstv %s1485_s16  ;;  %v523_v35 = vmul.f32 %v522_v31, %v521_v13 }
  0xa4   :  { %v543_v7 = vmax.f32 %v542_v47, 0.0  ;;  %v564_v34 = vadd.f32 %v563_v0, %v562_v27  ;;  %v544_v37 = vstv %s1491_s17  ;;  %v534_v11 = vmul.f32 %v533_v21, %v532_v45 }
  0xa5   :  { %v502_v14 = vadd.f32 %v501_v32, %v491_v44  ;;  %v554_v26 = vmax.f32 %v553_v28, 0.0  ;;  %v555_v38 = vstv %s721_s18  ;;  %v566_v46 = vstv %s722_s19 }
  0xa6   :  { %v545_v42 = vmul.f32 %v544_v37, %v543_v7  ;;  %v565_v18 = vmax.f32 %v564_v34, 0.0 }
  0xa7   :  { %v513_v12 = vadd.f32 %v512_v53, %v502_v14  ;;  %v556_v48 = vmul.f32 %v555_v38, %v554_v26 }
  0xa8   :  { %v567_v49 = vmul.f32 %v566_v46, %v565_v18 }
  0xa9   :  { %v524_v57 = vadd.f32 %v523_v35, %v513_v12 }
  0xab   :  { %v535_v15 = vadd.f32 %v534_v11, %v524_v57 }
  0xad   :  { %v546_v52 = vadd.f32 %v545_v42, %v535_v15 }
  0xaf   :  { %v557_v54 = vadd.f32 %v556_v48, %v546_v52 }
  0xb1   :  { %v568_v20 = vadd.f32 %v567_v49, %v557_v54 }
  0xb3   :  { %v723_v4 = vclamps-f32 %v568_v20, 30.0 }
  0xb5   :  { %v571_v39 = vsub.f32 0.0, %v723_v4 }
  0xb7   :  { %v572_v41 = vmul.f32 1.442695, %v571_v39 }
  0xb9   :  { %730 = vpow2.f32 %v572_v41 }
  0xc3   :  { %v731_v55 = vpop.eup %730 }
  0xc4   :  { %v574_v43 = vadd.f32 1.0, %v731_v55 }
  0xc6   :  { %732 = vrcp.f32 %v574_v43 }
  0xd0   :  { %v733_v50 = vpop.eup %732 }
  0xd1   :  { %v576_v58 = vmul.f32 %v733_v50, %v574_v43 }
  0xd3   :  { %v577_v59 = vsub.f32 2.0, %v576_v58 }
  0xd5   :  { %v578_v5 = vmul.f32 %v733_v50, %v577_v59 }
  0xd7   :  { %579 = vst [vmem:[#allocation13] sm:$0xff] %v578_v5 }
  0xd8   :  { %825 = shalt.err (!%p822_p7)
}
  0xd9   :  { %s826_s0 = scalar_lea.hbm %s1520_s6, 128 }
  0xda   :  { %p827_p8 = scmp.ne.s32.totalorder %s1520_s6, %s826_s0  ;;  %p830_p9 = scmp.lt.u32.totalorder %s826_s0, %s1520_s6 }
  0xdc   :  { %p832_p10 = pnand %p830_p9, %p827_p8 }
  0xde   :  { %835 = shalt.err (!%p832_p10)
}
  0xdf   :  { %589 = dma.vmem_to_hbm [thread:$0]  %s587_s21, 128, %s1520_s6, [#allocation5]  }
  0xe0   :  { %844 = dma.done.wait [#allocation5], 128  }
  0xe1   :  { %845 = vsyncadd [#allocation5], 4294967168 }
  0xe2   :  { %593 = vsyncpa [#allocation4], 1 }
  0xe3   :  { %594 = vsyncpa [#allocation8], 1 }
  0xe4   :  { %595 = vsyncpa [#allocation5], 1 }
  0xe5   :  { %596 = vsyncpa [#allocation6], 1 }
  0xe6   :  { %597 = vsyncpa [#allocation11], 1 }

</bundles_post_ra>
